<compile_context>
chip_gen: v7x
topology: tpu7x:2x2x1
jax: 0.10.0
libtpu: 0.0.40
codegen_flags: <defaults>
</compile_context>

<pallas_src>
import jax
import jax.numpy as jnp
from jax.experimental import pallas as pl
from jax.experimental.pallas import tpu as pltpu


def bottleneck_kernel(xt_ref, wce_ref, bce_ref, w2_ref, b2_ref, w3_ref, b3_ref,
                      out_ref, y1p_ref):
    # xt_ref: (1, 1, TH+2, W, Cin) -- row-halo'd tile of x (NHWC).
    r = pl.program_id(1)
    _, _, THp2, W, Cin = xt_ref.shape
    TH = THp2 - 2
    Wp = W + 2
    mid = w2_ref.shape[1]
    Cp = w3_ref.shape[1]          # padded output channels (multiple of 128)
    cdt = y1p_ref.dtype           # compute dtype for MXU operands

    x = xt_ref[0, 0].reshape(THp2 * W, Cin)

    # --- fused 1x1 convs: [dim_equalizer | conv1] in ONE MXU pass over x ---
    z = jnp.dot(x, wce_ref[...], preferred_element_type=jnp.float32) + bce_ref[...]
    eq = z[W:(TH + 1) * W, :Cp]                       # equalizer, interior rows
    y1 = jnp.maximum(z[:, Cp:], 0.0)                  # relu(conv1), halo rows too
    y1 = y1.reshape(THp2, W, mid).astype(cdt)

    # --- build zero-halo'd relu(conv1) in a VMEM scratch (conv2 input) ---
    y1p_ref[...] = jnp.zeros_like(y1p_ref)            # zero column halo
    y1p_ref[:, pl.ds(1, W), :] = y1                   # interior columns

    # First/last row tile: the halo row came from zero-padded x, so relu(conv1)
    # there is relu(b1); overwrite with the true zero padding of conv2's input.
    @pl.when(r == 0)
    def _():
        y1p_ref[0] = jnp.zeros((Wp, mid), cdt)

    @pl.when(r == pl.num_programs(1) - 1)
    def _():
        y1p_ref[THp2 - 1] = jnp.zeros((Wp, mid), cdt)

    # --- conv_block_3: 3x3 conv (pad=1) as a single im2col matmul + ReLU ---
    y1p = y1p_ref[...]                                # (TH+2, W+2, mid)
    cols = [jax.lax.slice(y1p, (dy, dx, 0), (dy + TH, dx + W, mid))
            for dy in range(3) for dx in range(3)]    # order matches w2 (ky,kx,cin)
    col = jnp.concatenate(cols, axis=-1).reshape(TH * W, 9 * mid)
    y2 = jnp.dot(col, w2_ref[...], preferred_element_type=jnp.float32) + b2_ref[...]
    y2 = jnp.maximum(y2, 0.0).astype(cdt)

    # --- conv_block_1: 1x1 conv (mid -> Cp) + ReLU, then residual add ---
    y3 = jnp.dot(y2, w3_ref[...], preferred_element_type=jnp.float32) + b3_ref[...]
    y3 = jnp.maximum(y3, 0.0)

    out_ref[0] = (y3 + eq).reshape(TH, W, Cp)


def _pick_row_tile(h, target=8):
    t = min(h, target)
    while h % t:
        t -= 1
    return t


def bottleneck_forward(x_nchw, params, *, row_tile=None, compute_dtype=jnp.float32):
    w1, b1, w2, b2, w3, b3, we, be = params
    N, Cin, H, W = x_nchw.shape
    mid = w1.shape[1]
    Cout = w3.shape[1]
    LANE = 128
    Cp = ((Cout + LANE - 1) // LANE) * LANE           # lane-dense output channels
    pc = Cp - Cout

    TH = row_tile if row_tile is not None else _pick_row_tile(H)
    assert H % TH == 0
    RT = H // TH

    # NCHW -> NHWC (channels on the lane dim).
    x = jnp.transpose(x_nchw, (0, 2, 3, 1))
    # Row-halo'd tiles (N, RT, TH+2, W, Cin): only a 1-row halo per tile is
    # replicated; no full-image spatial-pad round trip through HBM.
    xr = jnp.pad(x, ((0, 0), (1, 1), (0, 0), (0, 0)))
    xt = jnp.stack([xr[:, r * TH: r * TH + TH + 2] for r in range(RT)], axis=1)
    xt = xt.astype(compute_dtype)

    # Pad output-channel weights/biases to Cp (zeros -> padded lanes stay 0).
    w3p = jnp.pad(w3, ((0, 0), (0, pc)))
    b3p = jnp.pad(b3, (0, pc))
    wep = jnp.pad(we, ((0, 0), (0, pc)))
    bep = jnp.pad(be, (0, pc))

    # Fuse equalizer + conv1 into one (Cin, Cp+mid) weight; equalizer first so
    # both result slices start on a 128-lane boundary.
    wce = jnp.concatenate([wep, w1], axis=1).astype(compute_dtype)
    bce = jnp.concatenate([bep, b1])[None, :].astype(jnp.float32)

    w2c = w2.reshape(9 * mid, mid).astype(compute_dtype)   # (ky*3+kx)*mid x mid
    b2r = b2[None, :].astype(jnp.float32)
    w3c = w3p.astype(compute_dtype)
    b3r = b3p[None, :].astype(jnp.float32)

    out = pl.pallas_call(
        bottleneck_kernel,
        out_shape=jax.ShapeDtypeStruct((N, H, W, Cp), jnp.float32),
        grid=(N, RT),
        in_specs=[
            pl.BlockSpec((1, 1, TH + 2, W, Cin), lambda n, r: (n, r, 0, 0, 0)),
            pl.BlockSpec((Cin, Cp + mid), lambda n, r: (0, 0)),
            pl.BlockSpec((1, Cp + mid), lambda n, r: (0, 0)),
            pl.BlockSpec((9 * mid, mid), lambda n, r: (0, 0)),
            pl.BlockSpec((1, mid), lambda n, r: (0, 0)),
            pl.BlockSpec((mid, Cp), lambda n, r: (0, 0)),
            pl.BlockSpec((1, Cp), lambda n, r: (0, 0)),
        ],
        out_specs=pl.BlockSpec((1, TH, W, Cp), lambda n, r: (n, r, 0, 0)),
        scratch_shapes=[pltpu.VMEM((TH + 2, W + 2, mid), compute_dtype)],
        compiler_params=pltpu.CompilerParams(
            dimension_semantics=("parallel", "parallel"),
            vmem_limit_bytes=48 * 1024 * 1024),
    )(xt, wce, bce, w2c, b2r, w3c, b3r)

    out = out[..., :Cout]
    # NHWC -> NCHW to match the PyTorch module's output layout.
    # TODO(synk): drop this transpose if the downstream consumer accepts NHWC.
    return jnp.transpose(out, (0, 3, 1, 2))


def ref_forward(x_nchw, params):
    """Plain-JAX reference using lax.conv (NCHW, HWIO)."""
    w1, b1, w2, b2, w3, b3, we, be = params

    def conv(x, w_hwio, b, pad):
        y = jax.lax.conv_general_dilated(
            x, w_hwio, window_strides=(1, 1), padding=pad,
            dimension_numbers=('NCHW', 'HWIO', 'NCHW'))
        return y + b[None, :, None, None]

    y = jax.nn.relu(conv(x_nchw, w1[None, None], b1, 'VALID'))
    y = jax.nn.relu(conv(y, w2, b2, 'SAME'))
    y = jax.nn.relu(conv(y, w3[None, None], b3, 'VALID'))
    eq = conv(x_nchw, we[None, None], be, 'VALID')
    return y + eq


def make_params(key, in_dim, mid_dim, out_dim):
    ks = jax.random.split(key, 8)
    w1 = 0.2 * jax.random.normal(ks[0], (in_dim, mid_dim), jnp.float32)
    b1 = 0.1 * jax.random.normal(ks[1], (mid_dim,), jnp.float32)
    w2 = 0.2 * jax.random.normal(ks[2], (3, 3, mid_dim, mid_dim), jnp.float32)  # HWIO
    b2 = 0.1 * jax.random.normal(ks[3], (mid_dim,), jnp.float32)
    w3 = 0.2 * jax.random.normal(ks[4], (mid_dim, out_dim), jnp.float32)
    b3 = 0.1 * jax.random.normal(ks[5], (out_dim,), jnp.float32)
    we = 0.2 * jax.random.normal(ks[6], (in_dim, out_dim), jnp.float32)
    be = 0.1 * jax.random.normal(ks[7], (out_dim,), jnp.float32)
    return (w1, b1, w2, b2, w3, b3, we, be)


if __name__ == "__main__":
    N, in_dim, mid_dim, out_dim, H, W = 2, 4, 4, 8, 16, 16
    key = jax.random.PRNGKey(0)
    kx, kp = jax.random.split(key)
    x = jax.random.normal(kx, (N, in_dim, H, W), jnp.float32)   # NCHW like PyTorch
    params = make_params(kp, in_dim, mid_dim, out_dim)

    out = bottleneck_forward(x, params)                         # f32 compute path
    out = jax.block_until_ready(out)

    ref = ref_forward(x, params)
    assert out.shape == (N, out_dim, H, W)
    err = float(jnp.max(jnp.abs(out - ref)))
    assert jnp.allclose(out, ref, rtol=2e-4, atol=2e-4), err
    print("KERNEL_OK")
</pallas_src>

<mosaic_0001>
module attributes {stable_mosaic.version = 11 : i64} {
  func.func @bottleneck_kernel(%arg0: i32, %arg1: i32, %arg2: memref<1x1x10x16x4xf32, #tpu.memory_space<vmem>>, %arg3: memref<4x132xf32, #tpu.memory_space<vmem>>, %arg4: memref<1x132xf32, #tpu.memory_space<vmem>>, %arg5: memref<36x4xf32, #tpu.memory_space<vmem>>, %arg6: memref<1x4xf32, #tpu.memory_space<vmem>>, %arg7: memref<4x128xf32, #tpu.memory_space<vmem>>, %arg8: memref<1x128xf32, #tpu.memory_space<vmem>>, %arg9: memref<1x8x16x128xf32, #tpu.memory_space<vmem>>, %arg10: memref<10x18x4xf32, #tpu.memory_space<vmem>>) attributes {dimension_semantics = [#tpu.dimension_semantics<parallel>, #tpu.dimension_semantics<parallel>], iteration_bounds = array<i64: 2, 2>, scalar_prefetch = 0 : i64, scratch_operands = 1 : i64, tpu.core_type = #tpu.core_type<tc>, window_params = [{transform_indices = @transform_0, window_bounds = array<i64: 1, 1, 10, 16, 4>}, {pipeline_mode = #tpu.pipeline_mode<synchronous>, transform_indices = @transform_1, window_bounds = array<i64: 4, 132>}, {pipeline_mode = #tpu.pipeline_mode<synchronous>, transform_indices = @transform_2, window_bounds = array<i64: 1, 132>}, {pipeline_mode = #tpu.pipeline_mode<synchronous>, transform_indices = @transform_3, window_bounds = array<i64: 36, 4>}, {pipeline_mode = #tpu.pipeline_mode<synchronous>, transform_indices = @transform_4, window_bounds = array<i64: 1, 4>}, {pipeline_mode = #tpu.pipeline_mode<synchronous>, transform_indices = @transform_5, window_bounds = array<i64: 4, 128>}, {pipeline_mode = #tpu.pipeline_mode<synchronous>, transform_indices = @transform_6, window_bounds = array<i64: 1, 128>}, {transform_indices = @transform_7, window_bounds = array<i64: 1, 8, 16, 128>}]} {
    %c0 = arith.constant 0 : index
    %c0_0 = arith.constant 0 : index
    %c0_1 = arith.constant 0 : index
    %c0_2 = arith.constant 0 : index
    %c0_3 = arith.constant 0 : index
    %0 = vector.load %arg2[%c0, %c0_0, %c0_1, %c0_2, %c0_3] : memref<1x1x10x16x4xf32, #tpu.memory_space<vmem>>, vector<1x1x10x16x4xf32>
    %1 = vector.shape_cast %0 : vector<1x1x10x16x4xf32> to vector<10x16x4xf32>
    %2 = vector.shape_cast %1 : vector<10x16x4xf32> to vector<160x4xf32>
    %c0_4 = arith.constant 0 : index
    %c0_5 = arith.constant 0 : index
    %3 = vector.load %arg3[%c0_4, %c0_5] : memref<4x132xf32, #tpu.memory_space<vmem>>, vector<4x132xf32>
    %cst = arith.constant dense<0.000000e+00> : vector<160x132xf32>
    %4 = tpu.matmul %2, %3, %cst {dimension_numbers = #tpu.dot_dimension_numbers<[1], [0], [0], [1], [0, 0, 1, 1], [], []>} : vector<160x4xf32>, vector<4x132xf32>, vector<160x132xf32> -> vector<160x132xf32>
    %c0_6 = arith.constant 0 : index
    %c0_7 = arith.constant 0 : index
    %5 = vector.load %arg4[%c0_6, %c0_7] : memref<1x132xf32, #tpu.memory_space<vmem>>, vector<1x132xf32>
    %6 = vector.broadcast %5 : vector<1x132xf32> to vector<160x132xf32>
    %7 = arith.addf %4, %6 : vector<160x132xf32>
    %8 = vector.extract_strided_slice %7 {offsets = [16, 0], sizes = [128, 128], strides = [1, 1]} : vector<160x132xf32> to vector<128x128xf32>
    %9 = vector.extract_strided_slice %7 {offsets = [0, 128], sizes = [160, 4], strides = [1, 1]} : vector<160x132xf32> to vector<160x4xf32>
    %cst_8 = arith.constant 0.000000e+00 : f32
    %10 = vector.broadcast %cst_8 : f32 to vector<160x4xf32>
    %11 = arith.maximumf %9, %10 : vector<160x4xf32>
    %12 = vector.shape_cast %11 : vector<160x4xf32> to vector<10x16x4xf32>
    %cst_9 = arith.constant 0.000000e+00 : f32
    %13 = vector.broadcast %cst_9 : f32 to vector<10x18x4xf32>
    %c0_10 = arith.constant 0 : index
    %c0_11 = arith.constant 0 : index
    %c0_12 = arith.constant 0 : index
    %14 = vector.load %arg10[%c0_10, %c0_11, %c0_12] : memref<10x18x4xf32, #tpu.memory_space<vmem>>, vector<10x18x4xf32>
    tpu.vector_store %arg10[%c0_10, %c0_11, %c0_12], %13 {strides = array<i32>} : memref<10x18x4xf32, #tpu.memory_space<vmem>>, vector<10x18x4xf32>,
    %c0_13 = arith.constant 0 : index
    %c1 = arith.constant 1 : index
    %c0_14 = arith.constant 0 : index
    %15 = vector.load %arg10[%c0_13, %c1, %c0_14] : memref<10x18x4xf32, #tpu.memory_space<vmem>>, vector<10x16x4xf32>
    tpu.vector_store %arg10[%c0_13, %c1, %c0_14], %12 {strides = array<i32>} : memref<10x18x4xf32, #tpu.memory_space<vmem>>, vector<10x16x4xf32>,
    %c0_i32 = arith.constant 0 : i32
    %16 = arith.cmpi eq, %arg1, %c0_i32 : i32
    %17 = arith.extui %16 : i1 to i32
    %c0_i32_15 = arith.constant 0 : i32
    %18 = arith.cmpi ne, %17, %c0_i32_15 : i32
    scf.if %18 {
      %cst_36 = arith.constant 0.000000e+00 : f32
      %53 = vector.broadcast %cst_36 : f32 to vector<18x4xf32>
      %c0_37 = arith.constant 0 : index
      %c0_38 = arith.constant 0 : index
      %c0_39 = arith.constant 0 : index
      %54 = vector.load %arg10[%c0_37, %c0_38, %c0_39] : memref<10x18x4xf32, #tpu.memory_space<vmem>>, vector<1x18x4xf32>
      %55 = vector.shape_cast %54 : vector<1x18x4xf32> to vector<18x4xf32>
      %56 = vector.shape_cast %53 : vector<18x4xf32> to vector<1x18x4xf32>
      tpu.vector_store %arg10[%c0_37, %c0_38, %c0_39], %56 {strides = array<i32>} : memref<10x18x4xf32, #tpu.memory_space<vmem>>, vector<1x18x4xf32>,
    } else {
    }
    %c1_i32 = arith.constant 1 : i32
    %19 = arith.cmpi eq, %arg1, %c1_i32 : i32
    %20 = arith.extui %19 : i1 to i32
    %c0_i32_16 = arith.constant 0 : i32
    %21 = arith.cmpi ne, %20, %c0_i32_16 : i32
    scf.if %21 {
      %cst_36 = arith.constant 0.000000e+00 : f32
      %53 = vector.broadcast %cst_36 : f32 to vector<18x4xf32>
      %c9 = arith.constant 9 : index
      %c0_37 = arith.constant 0 : index
      %c0_38 = arith.constant 0 : index
      %54 = vector.load %arg10[%c9, %c0_37, %c0_38] : memref<10x18x4xf32, #tpu.memory_space<vmem>>, vector<1x18x4xf32>
      %55 = vector.shape_cast %54 : vector<1x18x4xf32> to vector<18x4xf32>
      %56 = vector.shape_cast %53 : vector<18x4xf32> to vector<1x18x4xf32>
      tpu.vector_store %arg10[%c9, %c0_37, %c0_38], %56 {strides = array<i32>} : memref<10x18x4xf32, #tpu.memory_space<vmem>>, vector<1x18x4xf32>,
    } else {
    }
    %c0_17 = arith.constant 0 : index
    %c0_18 = arith.constant 0 : index
    %c0_19 = arith.constant 0 : index
    %22 = vector.load %arg10[%c0_17, %c0_18, %c0_19] : memref<10x18x4xf32, #tpu.memory_space<vmem>>, vector<10x18x4xf32>
    %23 = vector.extract_strided_slice %22 {offsets = [0, 0, 0], sizes = [8, 16, 4], strides = [1, 1, 1]} : vector<10x18x4xf32> to vector<8x16x4xf32>
    %24 = vector.extract_strided_slice %22 {offsets = [0, 1, 0], sizes = [8, 16, 4], strides = [1, 1, 1]} : vector<10x18x4xf32> to vector<8x16x4xf32>
    %25 = vector.extract_strided_slice %22 {offsets = [0, 2, 0], sizes = [8, 16, 4], strides = [1, 1, 1]} : vector<10x18x4xf32> to vector<8x16x4xf32>
    %26 = vector.extract_strided_slice %22 {offsets = [1, 0, 0], sizes = [8, 16, 4], strides = [1, 1, 1]} : vector<10x18x4xf32> to vector<8x16x4xf32>
    %27 = vector.extract_strided_slice %22 {offsets = [1, 1, 0], sizes = [8, 16, 4], strides = [1, 1, 1]} : vector<10x18x4xf32> to vector<8x16x4xf32>
    %28 = vector.extract_strided_slice %22 {offsets = [1, 2, 0], sizes = [8, 16, 4], strides = [1, 1, 1]} : vector<10x18x4xf32> to vector<8x16x4xf32>
    %29 = vector.extract_strided_slice %22 {offsets = [2, 0, 0], sizes = [8, 16, 4], strides = [1, 1, 1]} : vector<10x18x4xf32> to vector<8x16x4xf32>
    %30 = vector.extract_strided_slice %22 {offsets = [2, 1, 0], sizes = [8, 16, 4], strides = [1, 1, 1]} : vector<10x18x4xf32> to vector<8x16x4xf32>
    %31 = vector.extract_strided_slice %22 {offsets = [2, 2, 0], sizes = [8, 16, 4], strides = [1, 1, 1]} : vector<10x18x4xf32> to vector<8x16x4xf32>
    %32 = tpu.concatenate %23, %24, %25, %26, %27, %28, %29, %30, %31 in 2 : vector<8x16x4xf32>, vector<8x16x4xf32>, vector<8x16x4xf32>, vector<8x16x4xf32>, vector<8x16x4xf32>, vector<8x16x4xf32>, vector<8x16x4xf32>, vector<8x16x4xf32>, vector<8x16x4xf32> -> vector<8x16x36xf32>
    %33 = vector.shape_cast %32 : vector<8x16x36xf32> to vector<128x36xf32>
    %c0_20 = arith.constant 0 : index
    %c0_21 = arith.constant 0 : index
    %34 = vector.load %arg5[%c0_20, %c0_21] : memref<36x4xf32, #tpu.memory_space<vmem>>, vector<36x4xf32>
    %cst_22 = arith.constant dense<0.000000e+00> : vector<128x4xf32>
    %35 = tpu.matmul %33, %34, %cst_22 {dimension_numbers = #tpu.dot_dimension_numbers<[1], [0], [0], [1], [0, 0, 1, 1], [], []>} : vector<128x36xf32>, vector<36x4xf32>, vector<128x4xf32> -> vector<128x4xf32>
    %c0_23 = arith.constant 0 : index
    %c0_24 = arith.constant 0 : index
    %36 = vector.load %arg6[%c0_23, %c0_24] : memref<1x4xf32, #tpu.memory_space<vmem>>, vector<1x4xf32>
    %37 = vector.broadcast %36 : vector<1x4xf32> to vector<128x4xf32>
    %38 = arith.addf %35, %37 : vector<128x4xf32>
    %cst_25 = arith.constant 0.000000e+00 : f32
    %39 = vector.broadcast %cst_25 : f32 to vector<128x4xf32>
    %40 = arith.maximumf %38, %39 : vector<128x4xf32>
    %c0_26 = arith.constant 0 : index
    %c0_27 = arith.constant 0 : index
    %41 = vector.load %arg7[%c0_26, %c0_27] : memref<4x128xf32, #tpu.memory_space<vmem>>, vector<4x128xf32>
    %cst_28 = arith.constant dense<0.000000e+00> : vector<128x128xf32>
    %42 = tpu.matmul %40, %41, %cst_28 {dimension_numbers = #tpu.dot_dimension_numbers<[1], [0], [0], [1], [0, 0, 1, 1], [], []>} : vector<128x4xf32>, vector<4x128xf32>, vector<128x128xf32> -> vector<128x128xf32>
    %c0_29 = arith.constant 0 : index
    %c0_30 = arith.constant 0 : index
    %43 = vector.load %arg8[%c0_29, %c0_30] : memref<1x128xf32, #tpu.memory_space<vmem>>, vector<1x128xf32>
    %44 = vector.broadcast %43 : vector<1x128xf32> to vector<128x128xf32>
    %45 = arith.addf %42, %44 : vector<128x128xf32>
    %cst_31 = arith.constant 0.000000e+00 : f32
    %46 = vector.broadcast %cst_31 : f32 to vector<128x128xf32>
    %47 = arith.maximumf %45, %46 : vector<128x128xf32>
    %48 = arith.addf %47, %8 : vector<128x128xf32>
    %49 = vector.shape_cast %48 : vector<128x128xf32> to vector<8x16x128xf32>
    %c0_32 = arith.constant 0 : index
    %c0_33 = arith.constant 0 : index
    %c0_34 = arith.constant 0 : index
    %c0_35 = arith.constant 0 : index
    %50 = vector.load %arg9[%c0_32, %c0_33, %c0_34, %c0_35] : memref<1x8x16x128xf32, #tpu.memory_space<vmem>>, vector<1x8x16x128xf32>
    %51 = vector.shape_cast %50 : vector<1x8x16x128xf32> to vector<8x16x128xf32>
    %52 = vector.shape_cast %49 : vector<8x16x128xf32> to vector<1x8x16x128xf32>
    tpu.vector_store %arg9[%c0_32, %c0_33, %c0_34, %c0_35], %52 {strides = array<i32>} : memref<1x8x16x128xf32, #tpu.memory_space<vmem>>, vector<1x8x16x128xf32>,
    return
  }
  func.func @transform_0(%arg0: i32, %arg1: i32) -> (i32, i32, i32, i32, i32) {
    %c0_i32 = arith.constant 0 : i32
    %c0_i32_0 = arith.constant 0 : i32
    %c0_i32_1 = arith.constant 0 : i32
    %c0_i32_2 = arith.constant 0 : i32
    return %arg0, %arg1, %c0_i32, %c0_i32_0, %c0_i32_1 : i32, i32, i32, i32, i32
  }
  func.func @transform_1(%arg0: i32, %arg1: i32) -> (i32, i32) {
    %c0_i32 = arith.constant 0 : i32
    %c0_i32_0 = arith.constant 0 : i32
    %c0_i32_1 = arith.constant 0 : i32
    return %c0_i32, %c0_i32_0 : i32, i32
  }
  func.func @transform_2(%arg0: i32, %arg1: i32) -> (i32, i32) {
    %c0_i32 = arith.constant 0 : i32
    %c0_i32_0 = arith.constant 0 : i32
    %c0_i32_1 = arith.constant 0 : i32
    return %c0_i32, %c0_i32_0 : i32, i32
  }
  func.func @transform_3(%arg0: i32, %arg1: i32) -> (i32, i32) {
    %c0_i32 = arith.constant 0 : i32
    %c0_i32_0 = arith.constant 0 : i32
    %c0_i32_1 = arith.constant 0 : i32
    return %c0_i32, %c0_i32_0 : i32, i32
  }
  func.func @transform_4(%arg0: i32, %arg1: i32) -> (i32, i32) {
    %c0_i32 = arith.constant 0 : i32
    %c0_i32_0 = arith.constant 0 : i32
    %c0_i32_1 = arith.constant 0 : i32
    return %c0_i32, %c0_i32_0 : i32, i32
  }
  func.func @transform_5(%arg0: i32, %arg1: i32) -> (i32, i32) {
    %c0_i32 = arith.constant 0 : i32
    %c0_i32_0 = arith.constant 0 : i32
    %c0_i32_1 = arith.constant 0 : i32
    return %c0_i32, %c0_i32_0 : i32, i32
  }
  func.func @transform_6(%arg0: i32, %arg1: i32) -> (i32, i32) {
    %c0_i32 = arith.constant 0 : i32
    %c0_i32_0 = arith.constant 0 : i32
    %c0_i32_1 = arith.constant 0 : i32
    return %c0_i32, %c0_i32_0 : i32, i32
  }
  func.func @transform_7(%arg0: i32, %arg1: i32) -> (i32, i32, i32, i32) {
    %c0_i32 = arith.constant 0 : i32
    %c0_i32_0 = arith.constant 0 : i32
    %c0_i32_1 = arith.constant 0 : i32
    return %arg0, %arg1, %c0_i32, %c0_i32_0 : i32, i32, i32, i32
  }
}

</mosaic_0001>

<bundles_post_ra>
// kernel: tpu_custom_call.1
= control target key start
LH: loop header
LB: loop body
LE: loop exit
PB: predicated region body
PF: predicated region fallthrough
CT: control target
= control target key end

     0   :  { %12 = vsyncpa [#allocation4], 0  ;;  %s3343_s0 = inlined_call_operand.vmem [shape: f32[2,2,10,16,4], index: 0, kind: input, shape index: {}]   ;;  %s3344_s1 = inlined_call_operand.vmem [shape: f32[4,132], index: 1, kind: input, shape index: {}]   ;;  %s3345_s2 = inlined_call_operand.vmem [shape: f32[1,132], index: 2, kind: input, shape index: {}]   ;;  %s3346_s3 = inlined_call_operand.vmem [shape: f32[36,4], index: 3, kind: input, shape index: {}]   ;;  %s3347_s4 = inlined_call_operand.vmem [shape: f32[1,4], index: 4, kind: input, shape index: {}]   ;;  %s3348_s5 = inlined_call_operand.vmem [shape: f32[4,128], index: 5, kind: input, shape index: {}]   ;;  %s3349_s6 = inlined_call_operand.vmem [shape: f32[1,128], index: 6, kind: input, shape index: {}]   ;;  %s3350_s7 = inlined_call_operand.hbm [shape: f32[2,16,16,128], index: 7, kind: output, shape index: {}]  }
   0x1   :  { %14 = vsyncpa [#allocation4 + $0x1], 0  ;;  %s2350_s24 = smov 0   ;;  %s2352_s25 = smov 0  }
   0x2   :  { %s2354_s26 = smov 0   ;;  %s2356_s27 = smov 0  }
   0x3   :  { %s2358_s28 = smov 0   ;;  %s2360_s29 = smov 0  }
   0x4   :  { %s2362_s30 = smov 0   ;;  %s2364_s8 = smov 0  }
   0x5 LB: > { %s1934_s9 = sadd.s32 4294967295, %s2295_s8   ;;  %s1935_s10 = sadd.s32 4294967294, %s2295_s8   ;;  %s2295_s8 = sphi %s2364_s8, %s20_s8   ;;  %s2291_s30 = sphi %s2362_s30, %s3373_s30   ;;  %s2287_s29 = sphi %s2360_s29, %s3372_s29   ;;  %s2283_s28 = sphi %s2358_s28, %s3371_s28   ;;  %s2279_s27 = sphi %s2356_s27, %s3370_s27   ;;  %s2275_s26 = sphi %s2354_s26, %s3369_s26   ;;  %s2271_s25 = sphi %s2352_s25, %s3368_s25   ;;  %s2267_s24 = sphi %s2350_s24, %s3367_s24  }
   0x6   : > { %s29_s11 = sadd.s32 1, %s2287_s29  ;;  %s32_s12 = sadd.s32 1, %s2291_s30 }
   0x7   : > { %p30_p0 = scmp.ge.s32.totalorder %s29_s11, 2  ;;  %p205_p1 = scmp.ne.s32.totalorder %s2275_s26, %s2271_s25 }
   0x8   : > { %p206_p2 = scmp.eq.s32.totalorder %s1934_s9, 3  ;;  %p211_p5 = scmp.ne.s32.totalorder %s2271_s25, %s2267_s24 }
   0x9   : > { %s3375_s11 = smov (%p30_p0, %s29_s11), 0  ;;  %s3377_s12 = smov (!%p30_p0, %s32_s12), %s2291_s30 }
   0xa   : > { %s191_s13 = ssub.s32 %s2287_s29, %s3375_s11  ;;  %p2401_p3 = por %p206_p2, %p205_p1 }
   0xb   : > { %p34_p4 = scmp.ge.s32.totalorder %s3377_s12, 2  ;;  %p212_p6 = scmp.eq.s32.totalorder %s1935_s10, 3 }
   0xc   : > { %p1938_p7 = scmp.ge.s32.totalorder %s2295_s8, 1  ;;  %p260_p9 = scmp.lt.s32.totalorder %s2295_s8, 5 }
   0xd   : > { %s3379_s12 = smov (%p34_p4, %s3377_s12), 0  ;;  %p2410_p8 = por %p212_p6, %p211_p5 }
   0xe   : > { %s190_s16 = ssub.s32 %s2291_s30, %s3379_s12  ;;  %s195_s17 = sadd.s32 1, %s2275_s26 }
   0xf   : > { %s192_s18 = sor.u32 %s191_s13, %s190_s16  ;;  %p261_p10 = pnand %p1938_p7, %p260_p9 }
  0x10   : > { %p193_p11 = scmp.eq.s32.totalorder %s192_s18, 0  ;;  %s3351_s20 = sand.u32 (!%p261_p10), 1, %s2271_s25   ;;  %v326_v0 = vld [vmem:[%s3344_s1] sm:$0xff] (!%p261_p10)  ;;  %vm402_vm0 = vcmask (!%p261_p10), 1043456   ;;  %vm341_vm1 = vcmask (!%p261_p10), 31744   ;;  %v2297_v2 = vmov (!%p261_p10), 0.0   ;;  %v329_v23 = vlaneseq (!%p261_p10) }
  0x11   : > { %264 = sbr.rel (%p261_p10) target bundleno = 1161 (0x489), region = 48  ;;  %p296_p12 = scmp.lt.s32.totalorder (!%p261_p10), %s2283_s28, 1  ;;  %v340_v1 = vcombine.high (!%p261_p10), %v326_v0, %v326_v0  ;;  %471 = vmatprep.mubr.f32.mxu0 (!%p261_p10), %v2297_v2  ;;  %608 = vst.msk [vmem:[#allocation2] sm:$0xff] (!%p261_p10), %vm341_vm1, %v2297_v2  ;;  %609 = vst.msk [vmem:[#allocation2 + $0x8] sm:$0xff] (!%p261_p10), %vm341_vm1, %v2297_v2  ;;  %v327_v26 = vld [vmem:[%s3345_s2] sm:$0x3] (!%p261_p10) }
  0x12   : > { %s2419_s19 = scalar_select %p193_p11, %s2275_s26, %s195_s17  }
  0x13   : > { %s2428_s23 = sshll.u32 (!%p261_p10), %s3351_s20, 7  ;;  %p298_p13 = scmp.lt.s32.totalorder (!%p261_p10), %s2279_s27, 1  ;;  %612 = vst.msk [vmem:[#allocation2 + $0x18] sm:$0xff] (!%p261_p10), %vm341_vm1, %v2297_v2  ;;  %613 = vst.msk [vmem:[#allocation2 + $0x20] sm:$0xff] (!%p261_p10), %vm341_vm1, %v2297_v2  ;;  %1941 = vmatprep.subr.msk.mxu0 (!%p261_p10), %vm402_vm0, %v340_v1  ;;  %v330_v24 = vshrl.u32 (!%p261_p10), %v329_v23, 7  ;;  %vm610_vm2 = vcmask (!%p261_p10), 25600  }
  0x14   : > { %615 = vst.msk [vmem:[#allocation2 + $0x30] sm:$0xff] (!%p261_p10), %vm341_vm1, %v2297_v2  ;;  %616 = vst.msk [vmem:[#allocation2 + $0x38] sm:$0xff] (!%p261_p10), %vm341_vm1, %v2297_v2  ;;  %1942 = vmatpush1.msk.msra.mxu0 (!%p261_p10), %vm402_vm0, %v326_v0  ;;  %p1963_p0 = scmp.ne.s32.totalorder (!%p261_p10), %s2279_s27, 0 }
  0x15   : > { %618 = vst.msk [vmem:[#allocation2 + $0x48] sm:$0xff] (!%p261_p10), %vm341_vm1, %v2297_v2  ;;  %619 = vst.msk [vmem:[#allocation2 + $0x50] sm:$0xff] (!%p261_p10), %vm341_vm1, %v2297_v2  ;;  %v331_v25 = vsub.s32 (!%p261_p10), 0, %v330_v24  ;;  %v335_v28 = vsub.s32 (!%p261_p10), 1, %v330_v24 }
  0x16   : > { %621 = vst.msk [vmem:[#allocation2 + $0x60] sm:$0xff] (!%p261_p10), %vm341_vm1, %v2297_v2  ;;  %622 = vst.msk [vmem:[#allocation2 + $0x68] sm:$0xff] (!%p261_p10), %vm341_vm1, %v2297_v2 }
  0x17   : > { %624 = vst.msk [vmem:[#allocation2 + $0x78] sm:$0xff] (!%p261_p10), %vm341_vm1, %v2297_v2  ;;  %625 = vst.msk [vmem:[#allocation2 + $0x80] sm:$0xff] (!%p261_p10), %vm341_vm1, %v2297_v2  ;;  %v2547_v27 = vrot.slane (!%p261_p10), %v327_v26, %v331_v25  ;;  %v2569_v29 = vrot.slane (!%p261_p10), %v327_v26, %v335_v28 }
  0x18   : > { %627 = vst.msk [vmem:[#allocation2 + $0x90] sm:$0xff] %vm341_vm1, %v2297_v2  ;;  %628 = vst.msk [vmem:[#allocation2 + $0x98] sm:$0xff] %vm341_vm1, %v2297_v2  ;;  %s297_s9 = scalar_select %p296_p12, %s2283_s28, 1 }
  0x19   : > { %630 = vst.msk [vmem:[#allocation2 + $0xa8] sm:$0xff] %vm341_vm1, %v2297_v2  ;;  %631 = vst.msk [vmem:[#allocation2 + $0xb0] sm:$0xff] %vm341_vm1, %v2297_v2  ;;  %s299_s10 = scalar_select %p298_p13, %s2279_s27, 1 }
  0x1a   : > { %633 = vst.msk [vmem:[#allocation2 + $0xc0] sm:$0xff] %vm341_vm1, %v2297_v2  ;;  %634 = vst.msk [vmem:[#allocation2 + $0xc8] sm:$0xff] %vm341_vm1, %v2297_v2  ;;  %s2116_s13 = smul.u32 40, %s297_s9 }
  0x1b   : > { %636 = vst.msk [vmem:[#allocation2 + $0xd8] sm:$0xff] %vm341_vm1, %v2297_v2  ;;  %637 = vst.msk [vmem:[#allocation2 + $0xe0] sm:$0xff] %vm341_vm1, %v2297_v2  ;;  %s2115_s16 = smul.u32 20, %s299_s10 }
  0x1c   : > { %611 = vst.msk [vmem:[#allocation2 + $0x10] sm:$0x3] %vm610_vm2, %v2297_v2  ;;  %614 = vst.msk [vmem:[#allocation2 + $0x28] sm:$0x3] %vm610_vm2, %v2297_v2 }
  0x1d   : > { %s302_s17 = sadd.s32 %s2116_s13, %s2115_s16  ;;  %617 = vst.msk [vmem:[#allocation2 + $0x40] sm:$0x3] %vm610_vm2, %v2297_v2  ;;  %620 = vst.msk [vmem:[#allocation2 + $0x58] sm:$0x3] %vm610_vm2, %v2297_v2 }
  0x1e   : > { %s1940_s18 = sshll.u32 %s302_s17, 3  ;;  %623 = vst.msk [vmem:[#allocation2 + $0x70] sm:$0x3] %vm610_vm2, %v2297_v2  ;;  %626 = vst.msk [vmem:[#allocation2 + $0x88] sm:$0x3] %vm610_vm2, %v2297_v2 }
  0x1f   : > { %s2483_s20 = scalar_lea.vmem %s3343_s0, %s1940_s18  ;;  %629 = vst.msk [vmem:[#allocation2 + $0xa0] sm:$0x3] %vm610_vm2, %v2297_v2  ;;  %632 = vst.msk [vmem:[#allocation2 + $0xb8] sm:$0x3] %vm610_vm2, %v2297_v2 }
  0x20   : > { %v306_v3 = vld [vmem:[%s2483_s20] sm:$0xff]  ;;  %v307_v4 = vld [vmem:[%s2483_s20 + $0x8] sm:$0xff]  ;;  %v308_v5 = vld [vmem:[%s2483_s20 + $0x10] sm:$0xff]  ;;  %635 = vst.msk [vmem:[#allocation2 + $0xd0] sm:$0x3] %vm610_vm2, %v2297_v2 }
  0x21   : > { %1943 = vmatmul.mubr.msk.f32.vlgmr.msra.gmra.mrb[0].mxu0 %vm341_vm1, %v306_v3  ;;  %v309_v6 = vld [vmem:[%s2483_s20 + $0x18] sm:$0xff]  ;;  %v310_v7 = vld [vmem:[%s2483_s20 + $0x20] sm:$0xff]  ;;  %v311_v8 = vld [vmem:[%s2483_s20 + $0x28] sm:$0xff]  ;;  %638 = vst.msk [vmem:[#allocation2 + $0xe8] sm:$0x3] %vm610_vm2, %v2297_v2 }
  0x22   : > { %476 = vmatprep.mubr.f32.mxu0 %v2297_v2  ;;  %v312_v9 = vld [vmem:[%s2483_s20 + $0x30] sm:$0xff]  ;;  %v313_v10 = vld [vmem:[%s2483_s20 + $0x38] sm:$0xff]  ;;  %v314_v11 = vld [vmem:[%s2483_s20 + $0x40] sm:$0xff] }
  0x23   : > { %v315_v12 = vld [vmem:[%s2483_s20 + $0x48] sm:$0xff]  ;;  %v316_v13 = vld [vmem:[%s2483_s20 + $0x50] sm:$0xff]  ;;  %v317_v14 = vld [vmem:[%s2483_s20 + $0x58] sm:$0xff] }
  0x24   : > { %v318_v15 = vld [vmem:[%s2483_s20 + $0x60] sm:$0xff]  ;;  %v319_v16 = vld [vmem:[%s2483_s20 + $0x68] sm:$0xff]  ;;  %v320_v17 = vld [vmem:[%s2483_s20 + $0x70] sm:$0xff] }
  0x25   : > { %1944 = vmatmul.mubr.msk.f32.gmra.mrb[2].mxu0 %vm341_vm1, %v307_v4  ;;  %v321_v18 = vld [vmem:[%s2483_s20 + $0x78] sm:$0xff]  ;;  %v322_v19 = vld [vmem:[%s2483_s20 + $0x80] sm:$0xff]  ;;  %v323_v20 = vld [vmem:[%s2483_s20 + $0x88] sm:$0xff] }
  0x26   : > { %481 = vmatprep.mubr.f32.mxu0 %v2297_v2  ;;  %v324_v21 = vld [vmem:[%s2483_s20 + $0x90] sm:$0xff]  ;;  %v325_v22 = vld [vmem:[%s2483_s20 + $0x98] sm:$0xff]  ;;  %s2660_s20 = scalar_lea.vmem [#allocation3], %s2428_s23 }
  0x29   : > { %1945 = vmatmul.mubr.msk.f32.gmra.mrb[4].mxu0 %vm341_vm1, %v308_v5 }
  0x2a   : > { %487 = vmatprep.mubr.f32.mxu0 %v2297_v2 }
  0x2d   : > { %1946 = vmatmul.mubr.msk.f32.gmra.mrb[6].mxu0 %vm341_vm1, %v309_v6 }
  0x2e   : > { %493 = vmatprep.mubr.f32.mxu0 %v2297_v2 }
  0x31   : > { %1947 = vmatmul.mubr.msk.f32.gmra.mrb[8].mxu0 %vm341_vm1, %v310_v7 }
  0x32   : > { %499 = vmatprep.mubr.f32.mxu0 %v2297_v2 }
  0x35   : > { %1948 = vmatmul.mubr.msk.f32.gmra.mrb[10].mxu0 %vm341_vm1, %v311_v8 }
  0x36   : > { %505 = vmatprep.mubr.f32.mxu0 %v2297_v2 }
  0x39   : > { %1949 = vmatmul.mubr.msk.f32.gmra.mrb[12].mxu0 %vm341_vm1, %v312_v9 }
  0x3a   : > { %511 = vmatprep.mubr.f32.mxu0 %v2297_v2 }
  0x3d   : > { %1950 = vmatmul.mubr.msk.f32.gmra.mrb[14].mxu0 %vm341_vm1, %v313_v10 }
  0x3e   : > { %517 = vmatprep.mubr.f32.mxu0 %v2297_v2 }
  0x41   : > { %1951 = vmatmul.mubr.msk.f32.gmra.mrb[16].mxu0 %vm341_vm1, %v314_v11 }
  0x42   : > { %523 = vmatprep.mubr.f32.mxu0 %v2297_v2 }
  0x45   : > { %1952 = vmatmul.mubr.msk.f32.gmra.mrb[18].mxu0 %vm341_vm1, %v315_v12 }
  0x46   : > { %529 = vmatprep.mubr.f32.mxu0 %v2297_v2 }
  0x49   : > { %1953 = vmatmul.mubr.msk.f32.gmra.mrb[20].mxu0 %vm341_vm1, %v316_v13 }
  0x4a   : > { %535 = vmatprep.mubr.f32.mxu0 %v2297_v2 }
  0x4d   : > { %1954 = vmatmul.mubr.msk.f32.gmra.mrb[22].mxu0 %vm341_vm1, %v317_v14 }
  0x4e   : > { %541 = vmatprep.mubr.f32.mxu0 %v2297_v2 }
  0x51   : > { %1955 = vmatmul.mubr.msk.f32.gmra.mrb[24].mxu0 %vm341_vm1, %v318_v15 }
  0x52   : > { %547 = vmatprep.mubr.f32.mxu0 %v2297_v2 }
  0x55   : > { %1956 = vmatmul.mubr.msk.f32.gmra.mrb[26].mxu0 %vm341_vm1, %v319_v16 }
  0x56   : > { %553 = vmatprep.mubr.f32.mxu0 %v2297_v2 }
  0x59   : > { %1957 = vmatmul.mubr.msk.f32.gmra.mrb[28].mxu0 %vm341_vm1, %v320_v17 }
  0x5a   : > { %559 = vmatprep.mubr.f32.mxu0 %v2297_v2 }
  0x5d   : > { %1958 = vmatmul.mubr.msk.f32.gmra.mrb[30].mxu0 %vm341_vm1, %v321_v18 }
  0x5e   : > { %565 = vmatprep.mubr.f32.mxu0 %v2297_v2 }
  0x61   : > { %1959 = vmatmul.mubr.msk.f32.gmra.mrb[32].mxu0 %vm341_vm1, %v322_v19 }
  0x62   : > { %571 = vmatprep.mubr.f32.mxu0 %v2297_v2 }
  0x65   : > { %1960 = vmatmul.mubr.msk.f32.gmra.mrb[34].mxu0 %vm341_vm1, %v323_v20 }
  0x66   : > { %577 = vmatprep.mubr.f32.mxu0 %v2297_v2 }
  0x69   : > { %1961 = vmatmul.mubr.msk.f32.gmra.mrb[36].mxu0 %vm341_vm1, %v324_v21 }
  0x6a   : > { %582 = vmatprep.mubr.f32.mxu0 %v2297_v2 }
  0x6d   : > { %1962 = vmatmul.mubr.msk.f32.gmra.mrb[38].mxu0 %vm341_vm1, %v325_v22 }
  0xf4   : > { %v473_v30 = vpop.f32.mrb[0].mxu0 }
  0xf5   : > { %v474_v31 = vpop.f32.mrb[1].mxu0 }
  0xf6   : > { %v475_v32 = vadd.f32 %v474_v31, %v2569_v29 }
  0xf8   : > { %v588_v33 = vmax.f32 %v475_v32, 0.0  ;;  %v478_v34 = vpop.f32.mrb[2].mxu0 }
  0xf9   : > { %v479_v35 = vpop.f32.mrb[3].mxu0 }
  0xfa   : > { %639 = vst.msk [vmem:[#allocation2 + $0x1] sm:$0xff] %vm341_vm1, %v588_v33  ;;  %v480_v36 = vadd.f32 %v479_v35, %v2569_v29 }
  0xfc   : > { %v589_v37 = vmax.f32 %v480_v36, 0.0  ;;  %v483_v38 = vpop.f32.mrb[4].mxu0 }
  0xfd   : > { %v2575_v39 = vadd.f32 %v483_v38, %v2547_v27  ;;  %v485_v40 = vpop.f32.mrb[5].mxu0 }
  0xfe   : > { %640 = vst.msk [vmem:[#allocation2 + $0x9] sm:$0xff] %vm341_vm1, %v589_v37  ;;  %v486_v41 = vadd.f32 %v485_v40, %v2569_v29 }
 0x100   : > { %v590_v42 = vmax.f32 %v486_v41, 0.0  ;;  %v489_v43 = vpop.f32.mrb[6].mxu0 }
 0x101   : > { %v2580_v44 = vadd.f32 %v489_v43, %v2547_v27  ;;  %v491_v45 = vpop.f32.mrb[7].mxu0 }
 0x102   : > { %641 = vst.msk [vmem:[#allocation2 + $0x19] sm:$0xff] %vm341_vm1, %v590_v42  ;;  %v492_v46 = vadd.f32 %v491_v45, %v2569_v29 }
 0x104   : > { %v591_v47 = vmax.f32 %v492_v46, 0.0  ;;  %v495_v48 = vpop.f32.mrb[8].mxu0 }
 0x105   : > { %v2585_v49 = vadd.f32 %v495_v48, %v2547_v27  ;;  %v497_v50 = vpop.f32.mrb[9].mxu0 }
 0x106   : > { %642 = vst.msk [vmem:[#allocation2 + $0x21] sm:$0xff] %vm341_vm1, %v591_v47  ;;  %v498_v51 = vadd.f32 %v497_v50, %v2569_v29 }
 0x108   : > { %v592_v52 = vmax.f32 %v498_v51, 0.0  ;;  %v501_v53 = vpop.f32.mrb[10].mxu0 }
 0x109   : > { %v2590_v54 = vadd.f32 %v501_v53, %v2547_v27  ;;  %v503_v55 = vpop.f32.mrb[11].mxu0 }
 0x10a   : > { %643 = vst.msk [vmem:[#allocation2 + $0x31] sm:$0xff] %vm341_vm1, %v592_v52  ;;  %v504_v56 = vadd.f32 %v503_v55, %v2569_v29 }
 0x10c   : > { %v593_v57 = vmax.f32 %v504_v56, 0.0  ;;  %v507_v58 = vpop.f32.mrb[12].mxu0 }
 0x10d   : > { %v2595_v59 = vadd.f32 %v507_v58, %v2547_v27  ;;  %v509_v60 = vpop.f32.mrb[13].mxu0 }
 0x10e   : > { %644 = vst.msk [vmem:[#allocation2 + $0x39] sm:$0xff] %vm341_vm1, %v593_v57  ;;  %v510_v61 = vadd.f32 %v509_v60, %v2569_v29 }
 0x110   : > { %v594_v62 = vmax.f32 %v510_v61, 0.0  ;;  %v513_v63 = vpop.f32.mrb[14].mxu0 }
 0x111   : > { %v2600_v0 = vadd.f32 %v513_v63, %v2547_v27  ;;  %v515_v1 = vpop.f32.mrb[15].mxu0 }
 0x112   : > { %645 = vst.msk [vmem:[#allocation2 + $0x49] sm:$0xff] %vm341_vm1, %v594_v62  ;;  %v516_v2 = vadd.f32 %v515_v1, %v2569_v29 }
 0x114   : > { %v595_v3 = vmax.f32 %v516_v2, 0.0  ;;  %v519_v4 = vpop.f32.mrb[16].mxu0 }
 0x115   : > { %v2605_v5 = vadd.f32 %v519_v4, %v2547_v27  ;;  %v521_v6 = vpop.f32.mrb[17].mxu0 }
 0x116   : > { %646 = vst.msk [vmem:[#allocation2 + $0x51] sm:$0xff] %vm341_vm1, %v595_v3  ;;  %v522_v7 = vadd.f32 %v521_v6, %v2569_v29  ;;  %v2298_v6 = vmov (!%p1963_p0), 0.0  }
 0x117   : > { %663 = vst.msk [vmem:[#allocation2] sm:$0xff] (!%p1963_p0), %vm341_vm1, %v2298_v6  ;;  %664 = vst.msk [vmem:[#allocation2 + $0x8] sm:$0xff] (!%p1963_p0), %vm341_vm1, %v2298_v6 }
 0x118   : > { %v596_v8 = vmax.f32 %v522_v7, 0.0  ;;  %v525_v9 = vpop.f32.mrb[18].mxu0  ;;  %665 = vst.msk [vmem:[#allocation2 + $0x10] sm:$0x3] (!%p1963_p0), %vm610_vm2, %v2298_v6 }
 0x119   : > { %v2610_v10 = vadd.f32 %v525_v9, %v2547_v27  ;;  %v527_v11 = vpop.f32.mrb[19].mxu0 }
 0x11a   : > { %647 = vst.msk [vmem:[#allocation2 + $0x61] sm:$0xff] %vm341_vm1, %v596_v8  ;;  %v528_v12 = vadd.f32 %v527_v11, %v2569_v29 }
 0x11c   : > { %v597_v13 = vmax.f32 %v528_v12, 0.0  ;;  %v531_v14 = vpop.f32.mrb[20].mxu0 }
 0x11d   : > { %v2615_v15 = vadd.f32 %v531_v14, %v2547_v27  ;;  %v533_v16 = vpop.f32.mrb[21].mxu0 }
 0x11e   : > { %648 = vst.msk [vmem:[#allocation2 + $0x69] sm:$0xff] %vm341_vm1, %v597_v13  ;;  %v534_v17 = vadd.f32 %v533_v16, %v2569_v29 }
 0x120   : > { %v598_v18 = vmax.f32 %v534_v17, 0.0  ;;  %v537_v19 = vpop.f32.mrb[22].mxu0 }
 0x121   : > { %v2620_v20 = vadd.f32 %v537_v19, %v2547_v27  ;;  %v539_v21 = vpop.f32.mrb[23].mxu0 }
 0x122   : > { %649 = vst.msk [vmem:[#allocation2 + $0x79] sm:$0xff] %vm341_vm1, %v598_v18  ;;  %v540_v22 = vadd.f32 %v539_v21, %v2569_v29 }
 0x124   : > { %v599_v23 = vmax.f32 %v540_v22, 0.0  ;;  %v543_v24 = vpop.f32.mrb[24].mxu0 }
 0x125   : > { %v2625_v25 = vadd.f32 %v543_v24, %v2547_v27  ;;  %v545_v26 = vpop.f32.mrb[25].mxu0 }
 0x126   : > { %650 = vst.msk [vmem:[#allocation2 + $0x81] sm:$0xff] %vm341_vm1, %v599_v23  ;;  %v546_v28 = vadd.f32 %v545_v26, %v2569_v29 }
 0x128   : > { %v600_v30 = vmax.f32 %v546_v28, 0.0  ;;  %v549_v31 = vpop.f32.mrb[26].mxu0 }
 0x129   : > { %v2630_v32 = vadd.f32 %v549_v31, %v2547_v27  ;;  %v551_v33 = vpop.f32.mrb[27].mxu0 }
 0x12a   : > { %651 = vst.msk [vmem:[#allocation2 + $0x91] sm:$0xff] %vm341_vm1, %v600_v30  ;;  %v552_v34 = vadd.f32 %v551_v33, %v2569_v29 }
 0x12c   : > { %v601_v35 = vmax.f32 %v552_v34, 0.0  ;;  %v555_v36 = vpop.f32.mrb[28].mxu0 }
 0x12d   : > { %v2635_v37 = vadd.f32 %v555_v36, %v2547_v27  ;;  %v557_v38 = vpop.f32.mrb[29].mxu0 }
 0x12e   : > { %652 = vst.msk [vmem:[#allocation2 + $0x99] sm:$0xff] %vm341_vm1, %v601_v35  ;;  %v558_v40 = vadd.f32 %v557_v38, %v2569_v29 }
 0x130   : > { %v602_v41 = vmax.f32 %v558_v40, 0.0  ;;  %v561_v42 = vpop.f32.mrb[30].mxu0 }
 0x131   : > { %v2640_v43 = vadd.f32 %v561_v42, %v2547_v27  ;;  %v563_v45 = vpop.f32.mrb[31].mxu0 }
 0x132   : > { %653 = vst.msk [vmem:[#allocation2 + $0xa9] sm:$0xff] %vm341_vm1, %v602_v41  ;;  %v564_v46 = vadd.f32 %v563_v45, %v2569_v29 }
 0x134   : > { %v603_v47 = vmax.f32 %v564_v46, 0.0  ;;  %v567_v48 = vpop.f32.mrb[32].mxu0 }
 0x135   : > { %v2645_v50 = vadd.f32 %v567_v48, %v2547_v27  ;;  %v569_v51 = vpop.f32.mrb[33].mxu0 }
 0x136   : > { %654 = vst.msk [vmem:[#allocation2 + $0xb1] sm:$0xff] %vm341_vm1, %v603_v47  ;;  %v570_v52 = vadd.f32 %v569_v51, %v2569_v29 }
 0x138   : > { %v604_v53 = vmax.f32 %v570_v52, 0.0  ;;  %v573_v55 = vpop.f32.mrb[34].mxu0 }
 0x139   : > { %v2650_v56 = vadd.f32 %v573_v55, %v2547_v27  ;;  %v575_v57 = vpop.f32.mrb[35].mxu0 }
 0x13a   : > { %655 = vst.msk [vmem:[#allocation2 + $0xc1] sm:$0xff] %vm341_vm1, %v604_v53  ;;  %v576_v58 = vadd.f32 %v575_v57, %v2569_v29 }
 0x13c   : > { %v605_v60 = vmax.f32 %v576_v58, 0.0  ;;  %v579_v61 = vpop.f32.mrb[36].mxu0 }
 0x13d   : > { %v580_v62 = vpop.f32.mrb[37].mxu0 }
 0x13e   : > { %656 = vst.msk [vmem:[#allocation2 + $0xc9] sm:$0xff] %vm341_vm1, %v605_v60  ;;  %v581_v63 = vadd.f32 %v580_v62, %v2569_v29 }
 0x140   : > { %v606_v1 = vmax.f32 %v581_v63, 0.0  ;;  %v584_v2 = vpop.f32.mrb[38].mxu0  ;;  %662 = sbr.rel (%p1963_p0) target bundleno = 327 (0x147), region = 52 }
 0x141   : > { %v585_v3 = vpop.f32.mrb[39].mxu0 }
 0x142   : > { %657 = vst.msk [vmem:[#allocation2 + $0xd9] sm:$0xff] %vm341_vm1, %v606_v1  ;;  %v586_v27 = vadd.f32 %v585_v3, %v2569_v29 }
 0x144   : > { %v607_v4 = vmax.f32 %v586_v27, 0.0 }
 0x146   : > { %658 = vst.msk [vmem:[#allocation2 + $0xe1] sm:$0xff] %vm341_vm1, %v607_v4 }
 0x147 PF: > { %p1964_p1 = scmp.ne.s32.totalorder %s2279_s27, 1 }
 0x148   : > { %v2299_v29 = vmov (!%p1964_p1), 0.0  }
 0x149   : > { %669 = sbr.rel (%p1964_p1) target bundleno = 336 (0x150), region = 56  ;;  %671 = vst.msk [vmem:[#allocation2 + $0xd8] sm:$0xff] (!%p1964_p1), %vm341_vm1, %v2299_v29  ;;  %672 = vst.msk [vmem:[#allocation2 + $0xe0] sm:$0xff] (!%p1964_p1), %vm341_vm1, %v2299_v29 }
 0x14a   : > { %673 = vst.msk [vmem:[#allocation2 + $0xe8] sm:$0x3] (!%p1964_p1), %vm610_vm2, %v2299_v29 }
 0x150 PF: > { %v2670_v7 = vld [vmem:[#allocation2] sm:$0xff]  ;;  %v2672_v8 = vld [vmem:[#allocation2 + $0x8] sm:$0xff]  ;;  %vm817_vm3 = vcmask 1045504   ;;  %vm728_vm4 = vcmask 1046528   ;;  %v676_v14 = vld [vmem:[#allocation2 + $0x10] sm:$0x3] }
 0x151   : > { %v818_v9 = vrot.slane %v2670_v7, 2  ;;  %v819_v11 = vrot.slane %v2672_v8, 2  ;;  %v729_v12 = vrot.slane %v2670_v7, 1  ;;  %v730_v13 = vrot.slane %v2672_v8, 1  ;;  %s3356_s23 = smov 8   ;;  %s3358_s13 = smov 4  }
 0x152   : > { %v821_v16 = vrot.slane %v676_v14, 2  ;;  %v732_v17 = vrot.slane %v676_v14, 1  ;;  %v2684_v23 = vld [vmem:[#allocation2 + $0x20] sm:$0xff]  ;;  %v2686_v24 = vld [vmem:[#allocation2 + $0x18] sm:$0xff]  ;;  %v679_v30 = vld [vmem:[#allocation2 + $0x28] sm:$0x3] }
 0x153   : > { %v820_v18 = vsel %vm817_vm3, %v818_v9, %v819_v11  ;;  %v731_v19 = vsel %vm728_vm4, %v729_v12, %v730_v13  ;;  %v734_v26 = vrot.slane %v2686_v24, 1  ;;  %v735_v28 = vrot.slane %v2684_v23, 1  ;;  %s2302_s16 = smov 12   ;;  %s3352_s17 = smov 16   ;;  %v2707_v41 = vld [vmem:[#allocation2 + $0x30] sm:$0xff]  ;;  %v2710_v45 = vld [vmem:[#allocation2 + $0x38] sm:$0xff] }
 0x154   : > { %858 = vrot.lane.b32.xlu1 %v820_v18, %s3356_s23  ;;  %769 = vrot.lane.b32.xlu0 %v731_v19, %s3358_s13  ;;  %v822_v21 = vsel %vm817_vm3, %v819_v11, %v821_v16  ;;  %v733_v22 = vsel %vm728_vm4, %v730_v13, %v732_v17  ;;  %v823_v33 = vrot.slane %v2686_v24, 2  ;;  %v824_v34 = vrot.slane %v2684_v23, 2  ;;  %s3354_s18 = smov 20   ;;  %v1355_v46 = vld [vmem:[%s3346_s3] sm:$0xff]  ;;  %v1356_v47 = vld [vmem:[%s3346_s3 + $0x8] sm:$0xff]  ;;  %s3362_s21 = smov 16  }
 0x155   : > { %v736_v31 = vsel %vm728_vm4, %v734_v26, %v735_v28  ;;  %v737_v35 = vrot.slane %v679_v30, 1  ;;  %v826_v40 = vrot.slane %v679_v30, 2  ;;  %v2107_v48 = vpack.c.bf16 %v1356_v47, %v1355_v46  ;;  %v1357_v53 = vld [vmem:[%s3346_s3 + $0x10] sm:$0xff]  ;;  %v1358_v55 = vld [vmem:[%s3346_s3 + $0x18] sm:$0xff]  ;;  %v682_v60 = vld [vmem:[#allocation2 + $0x40] sm:$0x3] }
 0x156   : > { %v825_v36 = vsel %vm817_vm3, %v823_v33, %v824_v34  ;;  %v739_v51 = vrot.slane %v2707_v41, 1  ;;  %v740_v52 = vrot.slane %v2710_v45, 1  ;;  %v2111_v58 = vpack.c.bf16 %v1358_v55, %v1357_v53  ;;  %v1359_v61 = vld [vmem:[%s3346_s3 + $0x20] sm:$0xf]  ;;  %s3364_s22 = smov 20   ;;  %s3365_s9 = smov 8  }
 0x157   : > { %v738_v38 = vsel %vm728_vm4, %v735_v28, %v737_v35  ;;  %v827_v42 = vsel %vm817_vm3, %v824_v34, %v826_v40  ;;  %2108 = vmatprep.subr.bf16.mxu1 %v2107_v48  ;;  %v828_v62 = vrot.slane %v2707_v41, 2  ;;  %v829_v63 = vrot.slane %v2710_v45, 2  ;;  %v2757_v6 = vld [vmem:[#allocation2 + $0x48] sm:$0xff]  ;;  %v2759_v29 = vld [vmem:[#allocation2 + $0x50] sm:$0xff]  ;;  %v685_v13 = vld [vmem:[#allocation2 + $0x58] sm:$0x3] }
 0x158   : > { %860 = vrot.lane.b32.xlu1 %v822_v21, %s3356_s23  ;;  %771 = vrot.lane.b32.xlu0 %v733_v22, %s3358_s13  ;;  %v741_v57 = vsel %vm728_vm4, %v739_v51, %v740_v52  ;;  %v742_v1 = vrot.slane %v682_v60, 1  ;;  %v831_v27 = vrot.slane %v682_v60, 2  ;;  %v744_v9 = vrot.slane %v2757_v6, 1  ;;  %v2789_v26 = vld [vmem:[#allocation2 + $0x60] sm:$0xff]  ;;  %v2791_v28 = vld [vmem:[#allocation2 + $0x68] sm:$0xff] }
 0x159   : > { %2110 = vmatpush3.bf16.msra.mxu1 %v2107_v48  ;;  %v830_v2 = vsel %vm817_vm3, %v828_v62, %v829_v63  ;;  %v745_v11 = vrot.slane %v2759_v29, 1  ;;  %v833_v14 = vrot.slane %v2757_v6, 2  ;;  %v834_v16 = vrot.slane %v2759_v29, 2  ;;  %v688_v34 = vld [vmem:[#allocation2 + $0x70] sm:$0x3] }
 0x15a   : > { %2112 = vmatprep.subr.bf16.mxu1 %v2111_v58  ;;  %v743_v3 = vsel %vm728_vm4, %v740_v52, %v742_v1  ;;  %v832_v4 = vsel %vm817_vm3, %v829_v63, %v831_v27  ;;  %v747_v17 = vrot.slane %v685_v13, 1  ;;  %v836_v21 = vrot.slane %v685_v13, 2  ;;  %v2821_v52 = vld [vmem:[#allocation2 + $0x78] sm:$0xff] }
 0x15b   : > { %v746_v12 = vsel %vm728_vm4, %v744_v9, %v745_v11  ;;  %v835_v18 = vsel %vm817_vm3, %v833_v14, %v834_v16  ;;  %v749_v30 = vrot.slane %v2789_v26, 1  ;;  %v838_v35 = vrot.slane %v2789_v26, 2 }
 0x15c   : > { %910 = vrot.lane.b32.xlu1 %v2684_v23, %s2302_s16  ;;  %908 = vrot.lane.b32.xlu0 %v2686_v24, %s2302_s16  ;;  %v748_v19 = vsel %vm728_vm4, %v745_v11, %v747_v17  ;;  %v837_v22 = vsel %vm817_vm3, %v834_v16, %v836_v21  ;;  %v841_v46 = vrot.slane %v688_v34, 2  ;;  %v843_v27 = vrot.slane %v2821_v52, 2 }
 0x15d   : > { %2114 = vmatpush3.bf16.msra.mxu1 %v2111_v58  ;;  %v754_v58 = vrot.slane %v2821_v52, 1  ;;  %vm1236_vm5 = vcmask 64512   ;;  %vm1253_vm6 = vcmask 97280   ;;  %vm1270_vm7 = vcmask 130048  }
 0x15e   : > { %2055 = vmatprep.subr.msk.mxu1 %vm402_vm0, %v1359_v61  ;;  %vm1287_vm8 = vcmask 162816   ;;  %vm1304_vm9 = vcmask 195584   ;;  %vm1321_vm10 = vcmask 228352   ;;  %vm1338_vm11 = vcmask 261120  }
 0x15f   : > { %vm1367_vm12 = vcmask 293888  }
 0x160   : > { %773 = vrot.lane.b32.xlu1 %v736_v31, %s3358_s13  ;;  %962 = vrot.lane.b32.xlu0 %v736_v31, %s3352_s17  ;;  %v750_v31 = vrot.slane %v2791_v28, 1 }
 0x161   : > { %2056 = vmatpush3.msk.msra.mxu1 %vm402_vm0, %v1359_v61 }
 0x162   : > { %v751_v33 = vsel %vm728_vm4, %v749_v30, %v750_v31 }
 0x164   : > { %1015 = vrot.lane.b32.xlu1 %v825_v36, %s3354_s18  ;;  %964 = vrot.lane.b32.xlu0 %v738_v38, %s3352_s17  ;;  %s2305_s17 = smov 24  }
 0x168   : > { %862 = vrot.lane.b32.xlu1 %v825_v36, %s3356_s23  ;;  %775 = vrot.lane.b32.xlu0 %v738_v38, %s3358_s13  ;;  %s3363_s13 = smov 4   ;;  %v839_v36 = vrot.slane %v2791_v28, 2  ;;  %v752_v38 = vrot.slane %v688_v34, 1 }
 0x16a   : > { %v840_v40 = vsel %vm817_vm3, %v838_v35, %v839_v36  ;;  %v842_v47 = vsel %vm817_vm3, %v839_v36, %v841_v46  ;;  %v2879_v46 = vld [vmem:[#allocation2 + $0x98] sm:$0xff] }
 0x16c   : > { %1065 = vrot.lane.b32.xlu1 %v2707_v41, %s2305_s17  ;;  %1017 = vrot.lane.b32.xlu0 %v827_v42, %s3354_s18  ;;  %s2306_s18 = smov 28  }
 0x170   : > { %912 = vrot.lane.b32.xlu1 %v2707_v41, %s2302_s16  ;;  %864 = vrot.lane.b32.xlu0 %v827_v42, %s3356_s23  ;;  %s2307_s23 = smov 32   ;;  %v753_v42 = vsel %vm728_vm4, %v750_v31, %v752_v38  ;;  %v2872_v38 = vld [vmem:[#allocation2 + $0x90] sm:$0xff] }
 0x174   : > { %1119 = vrot.lane.b32.xlu1 %v741_v57, %s2306_s18  ;;  %1067 = vrot.lane.b32.xlu0 %v2710_v45, %s2305_s17 }
 0x178   : > { %966 = vrot.lane.b32.xlu1 %v741_v57, %s3362_s21  ;;  %914 = vrot.lane.b32.xlu0 %v2710_v45, %s2302_s16 }
 0x17c   : > { %1172 = vrot.lane.b32.xlu1 %v830_v2, %s2307_s23  ;;  %1121 = vrot.lane.b32.xlu0 %v743_v3, %s2306_s18 }
 0x180   : > { %968 = vrot.lane.b32.xlu1 %v743_v3, %s3362_s21  ;;  %777 = vrot.lane.b32.xlu0 %v741_v57, %s3363_s13  ;;  %v2827_v57 = vld [vmem:[#allocation2 + $0x80] sm:$0xff] }
 0x181   : > { %v755_v60 = vrot.slane %v2827_v57, 1 }
 0x183   : > { %v756_v63 = vsel %vm728_vm4, %v754_v58, %v755_v60  ;;  %v759_v58 = vrot.slane %v2872_v38, 1 }
 0x184   : > { %1174 = vrot.lane.b32.xlu1 %v832_v4, %s2307_s23  ;;  %1019 = vrot.lane.b32.xlu0 %v830_v2, %s3364_s22 }
 0x188   : > { %866 = vrot.lane.b32.xlu1 %v830_v2, %s3365_s9  ;;  %779 = vrot.lane.b32.xlu0 %v743_v3, %s3363_s13  ;;  %v691_v3 = vld [vmem:[#allocation2 + $0x88] sm:$0x3] }
 0x189   : > { %v757_v9 = vrot.slane %v691_v3, 1 }
 0x18b   : > { %v758_v14 = vsel %vm728_vm4, %v755_v60, %v757_v9  ;;  %v760_v60 = vrot.slane %v2879_v46, 1 }
 0x18c   : > { %1069 = vrot.lane.b32.xlu1 %v2757_v6, %s2305_s17  ;;  %1021 = vrot.lane.b32.xlu0 %v832_v4, %s3364_s22 }
 0x18d   : > { %v761_v9 = vsel %vm728_vm4, %v759_v58, %v760_v60 }
 0x190   : > { %916 = vrot.lane.b32.xlu1 %v2757_v6, %s2302_s16  ;;  %868 = vrot.lane.b32.xlu0 %v832_v4, %s3365_s9  ;;  %v844_v4 = vrot.slane %v2827_v57, 2 }
 0x192   : > { %v845_v13 = vsel %vm817_vm3, %v843_v27, %v844_v4 }
 0x194   : > { %1123 = vrot.lane.b32.xlu1 %v746_v12, %s2306_s18  ;;  %1071 = vrot.lane.b32.xlu0 %v2759_v29, %s2305_s17 }
 0x198   : > { %970 = vrot.lane.b32.xlu1 %v746_v12, %s3362_s21  ;;  %918 = vrot.lane.b32.xlu0 %v2759_v29, %s2302_s16 }
 0x19c   : > { %1176 = vrot.lane.b32.xlu1 %v835_v18, %s2307_s23  ;;  %1125 = vrot.lane.b32.xlu0 %v748_v19, %s2306_s18 }
 0x1a0   : > { %972 = vrot.lane.b32.xlu1 %v748_v19, %s3362_s21  ;;  %781 = vrot.lane.b32.xlu0 %v746_v12, %s3363_s13 }
 0x1a4   : > { %1178 = vrot.lane.b32.xlu1 %v837_v22, %s2307_s23  ;;  %1023 = vrot.lane.b32.xlu0 %v835_v18, %s3364_s22 }
 0x1a8   : > { %870 = vrot.lane.b32.xlu1 %v835_v18, %s3365_s9  ;;  %783 = vrot.lane.b32.xlu0 %v748_v19, %s3363_s13  ;;  %v846_v18 = vrot.slane %v691_v3, 2 }
 0x1ac   : > { %1073 = vrot.lane.b32.xlu1 %v2789_v26, %s2305_s17  ;;  %1025 = vrot.lane.b32.xlu0 %v837_v22, %s3364_s22 }
 0x1b0   : > { %920 = vrot.lane.b32.xlu1 %v2789_v26, %s2302_s16  ;;  %872 = vrot.lane.b32.xlu0 %v837_v22, %s3365_s9  ;;  %v847_v22 = vsel %vm817_vm3, %v844_v4, %v846_v18 }
 0x1b4   : > { %1127 = vrot.lane.b32.xlu1 %v751_v33, %s2306_s18  ;;  %1075 = vrot.lane.b32.xlu0 %v2791_v28, %s2305_s17 }
 0x1b8   : > { %974 = vrot.lane.b32.xlu1 %v751_v33, %s3362_s21  ;;  %922 = vrot.lane.b32.xlu0 %v2791_v28, %s2302_s16 }
 0x1bc   : > { %1180 = vrot.lane.b32.xlu1 %v840_v40, %s2307_s23  ;;  %1129 = vrot.lane.b32.xlu0 %v753_v42, %s2306_s18 }
 0x1c0   : > { %976 = vrot.lane.b32.xlu1 %v753_v42, %s3362_s21  ;;  %785 = vrot.lane.b32.xlu0 %v751_v33, %s3363_s13 }
 0x1c4   : > { %1182 = vrot.lane.b32.xlu1 %v842_v47, %s2307_s23  ;;  %1027 = vrot.lane.b32.xlu0 %v840_v40, %s3364_s22 }
 0x1c6   : > { %v859_v48 = vpop.permute.xlu1 %858  ;;  %v770_v51 = vpop.permute.xlu0 %769 }
 0x1c7   : > { %v1220_v33 = vsel %vm341_vm1, %v2670_v7, %v770_v51 }
 0x1c8   : > { %874 = vrot.lane.b32.xlu1 %v840_v40, %s3365_s9  ;;  %787 = vrot.lane.b32.xlu0 %v753_v42, %s3363_s13  ;;  %v1237_v36 = vsel %vm1236_vm5, %v1220_v33, %v859_v48 }
 0x1ca   : > { %v2823_v53 = vpop.permute.xlu1 %860  ;;  %v2825_v55 = vpop.permute.xlu0 %771 }
 0x1cc   : > { %1077 = vrot.lane.b32.xlu1 %v2821_v52, %s2305_s17  ;;  %1029 = vrot.lane.b32.xlu0 %v842_v47, %s3364_s22 }
 0x1ce   : > { %v2834_v61 = vpop.permute.xlu1 %910  ;;  %v909_v62 = vpop.permute.xlu0 %908 }
 0x1cf   : > { %v1254_v40 = vsel %vm1253_vm6, %v1237_v36, %v909_v62  ;;  %v1221_v62 = vsel %vm341_vm1, %v2672_v8, %v2825_v55 }
 0x1d0   : > { %924 = vrot.lane.b32.xlu1 %v2821_v52, %s2302_s16  ;;  %876 = vrot.lane.b32.xlu0 %v842_v47, %s3365_s9  ;;  %v1238_v4 = vsel %vm1236_vm5, %v1221_v62, %v2823_v53 }
 0x1d1   : > { %v1255_v8 = vsel %vm1253_vm6, %v1238_v4, %v2834_v61  ;;  %v849_v61 = vrot.slane %v2879_v46, 2 }
 0x1d2   : > { %v2840_v1 = vpop.permute.xlu1 %773  ;;  %v963_v2 = vpop.permute.xlu0 %962 }
 0x1d3   : > { %v1271_v47 = vsel %vm1270_vm7, %v1254_v40, %v963_v2 }
 0x1d4   : > { %1131 = vrot.lane.b32.xlu1 %v756_v63, %s2306_s18  ;;  %1079 = vrot.lane.b32.xlu0 %v2827_v57, %s2305_s17 }
 0x1d6   : > { %v1016_v11 = vpop.permute.xlu1 %1015  ;;  %v965_v12 = vpop.permute.xlu0 %964 }
 0x1d7   : > { %v1288_v51 = vsel %vm1287_vm8, %v1271_v47, %v1016_v11 }
 0x1d8   : > { %978 = vrot.lane.b32.xlu1 %v756_v63, %s3362_s21  ;;  %926 = vrot.lane.b32.xlu0 %v2827_v57, %s2302_s16 }
 0x1da   : > { %v2852_v16 = vpop.permute.xlu1 %862  ;;  %v2854_v17 = vpop.permute.xlu0 %775 }
 0x1dc   : > { %1184 = vrot.lane.b32.xlu1 %v845_v13, %s2307_s23  ;;  %1133 = vrot.lane.b32.xlu0 %v758_v14, %s2306_s18 }
 0x1de   : > { %v1066_v19 = vpop.permute.xlu1 %1065  ;;  %v1018_v21 = vpop.permute.xlu0 %1017 }
 0x1df   : > { %v1305_v48 = vsel %vm1304_vm9, %v1288_v51, %v1066_v19  ;;  %v848_v19 = vrot.slane %v2872_v38, 2 }
 0x1e0   : > { %980 = vrot.lane.b32.xlu1 %v758_v14, %s3362_s21  ;;  %789 = vrot.lane.b32.xlu0 %v756_v63, %s3363_s13 }
 0x1e2   : > { %v2861_v30 = vpop.permute.xlu1 %912  ;;  %v2863_v31 = vpop.permute.xlu0 %864 }
 0x1e4   : > { %1186 = vrot.lane.b32.xlu1 %v847_v22, %s2307_s23  ;;  %1031 = vrot.lane.b32.xlu0 %v845_v13, %s3364_s22 }
 0x1e6   : > { %v1120_v34 = vpop.permute.xlu1 %1119  ;;  %v1068_v35 = vpop.permute.xlu0 %1067 }
 0x1e7   : > { %v1322_v63 = vsel %vm1321_vm10, %v1305_v48, %v1120_v34 }
 0x1e8   : > { %878 = vrot.lane.b32.xlu1 %v845_v13, %s3365_s9  ;;  %791 = vrot.lane.b32.xlu0 %v758_v14, %s3363_s13  ;;  %v694_v13 = vld [vmem:[#allocation2 + $0xa0] sm:$0x3]  ;;  %v1272_v14 = vsel %vm1270_vm7, %v1255_v8, %v965_v12 }
 0x1e9   : > { %v1289_v18 = vsel %vm1287_vm8, %v1272_v14, %v1018_v21  ;;  %v850_v21 = vsel %vm817_vm3, %v848_v19, %v849_v61  ;;  %v851_v51 = vrot.slane %v694_v13, 2 }
 0x1ea   : > { %v2875_v42 = vpop.permute.xlu1 %966  ;;  %v2877_v7 = vpop.permute.xlu0 %914  ;;  %v1306_v53 = vsel %vm1304_vm9, %v1289_v18, %v1068_v35  ;;  %v2953_v18 = vld [vmem:[#allocation2 + $0xb0] sm:$0xff] }
 0x1eb   : > { %v852_v62 = vsel %vm817_vm3, %v849_v61, %v851_v51 }
 0x1ec   : > { %1081 = vrot.lane.b32.xlu1 %v2872_v38, %s2305_s17  ;;  %1033 = vrot.lane.b32.xlu0 %v847_v22, %s3364_s22 }
 0x1ee   : > { %v1173_v2 = vpop.permute.xlu1 %1172  ;;  %v1122_v3 = vpop.permute.xlu0 %1121 }
 0x1ef   : > { %v1339_v27 = vsel %vm1338_vm11, %v1322_v63, %v1173_v2  ;;  %v1323_v33 = vsel %vm1321_vm10, %v1306_v53, %v1122_v3  ;;  %v765_v53 = vrot.slane %v2953_v18, 1 }
 0x1f0   : > { %928 = vrot.lane.b32.xlu1 %v2872_v38, %s2302_s16  ;;  %880 = vrot.lane.b32.xlu0 %v847_v22, %s3365_s9  ;;  %v762_v22 = vrot.slane %v694_v13, 1 }
 0x1f1   : > { %2057 = vmatprep.mubr.msk.f32.mxu1 %vm1367_vm12, %v1339_v27  ;;  %v1222_v27 = vsel %vm341_vm1, %v2686_v24, %v2840_v1 }
 0x1f2   : > { %v2903_v55 = vpop.permute.xlu1 %968  ;;  %v2905_v11 = vpop.permute.xlu0 %777  ;;  %v763_v35 = vsel %vm728_vm4, %v760_v60, %v762_v22  ;;  %v1239_v4 = vsel %vm1236_vm5, %v1222_v27, %v2852_v16 }
 0x1f3   : > { %v1256_v8 = vsel %vm1253_vm6, %v1239_v4, %v2861_v30 }
 0x1f4   : > { %1135 = vrot.lane.b32.xlu1 %v761_v9, %s2306_s18  ;;  %1083 = vrot.lane.b32.xlu0 %v2879_v46, %s2305_s17  ;;  %v1273_v24 = vsel %vm1270_vm7, %v1256_v8, %v2875_v42  ;;  %v1223_v42 = vsel %vm341_vm1, %v2684_v23, %v2854_v17  ;;  %v697_v23 = vld [vmem:[#allocation2 + $0xb8] sm:$0x3] }
 0x1f6   : > { %v1175_v34 = vpop.permute.xlu1 %1174  ;;  %v1020_v36 = vpop.permute.xlu0 %1019 }
 0x1f7   : > { %v1340_v12 = vsel %vm1338_vm11, %v1323_v33, %v1175_v34  ;;  %v1290_v1 = vsel %vm1287_vm8, %v1273_v24, %v1020_v36  ;;  %v1240_v34 = vsel %vm1236_vm5, %v1223_v42, %v2863_v31  ;;  %v1224_v42 = vsel %vm341_vm1, %v2707_v41, %v2905_v11 }
 0x1f8   : > { %982 = vrot.lane.b32.xlu1 %v761_v9, %s3362_s21  ;;  %930 = vrot.lane.b32.xlu0 %v2879_v46, %s2302_s16 }
 0x1f9   : > { %2058 = vmatmul.mubr.msk.f32.vlgmr.msra.gmra.mrb[0].mxu1 %vm1367_vm12, %v1340_v12  ;;  %v1257_v12 = vsel %vm1253_vm6, %v1240_v34, %v2877_v7  ;;  %v854_v7 = vrot.slane %v2953_v18, 2 }
 0x1fa   : > { %v2923_v40 = vpop.permute.xlu1 %866  ;;  %v2925_v47 = vpop.permute.xlu0 %779  ;;  %v1274_v17 = vsel %vm1270_vm7, %v1257_v12, %v2903_v55 }
 0x1fb   : > { %v1241_v34 = vsel %vm1236_vm5, %v1224_v42, %v2923_v40 }
 0x1fc   : > { %1188 = vrot.lane.b32.xlu1 %v850_v21, %s2307_s23  ;;  %1137 = vrot.lane.b32.xlu0 %v763_v35, %s2306_s18 }
 0x1fe   : > { %v1070_v48 = vpop.permute.xlu1 %1069  ;;  %v1022_v58 = vpop.permute.xlu0 %1021 }
 0x1ff   : > { %v1307_v16 = vsel %vm1304_vm9, %v1290_v1, %v1070_v48  ;;  %v1291_v51 = vsel %vm1287_vm8, %v1274_v17, %v1022_v58  ;;  %v856_v1 = vrot.slane %v697_v23, 2 }
 0x200   : > { %984 = vrot.lane.b32.xlu1 %v763_v35, %s3362_s21  ;;  %793 = vrot.lane.b32.xlu0 %v761_v9, %s3363_s13  ;;  %v2945_v9 = vld [vmem:[#allocation2 + $0xa8] sm:$0xff] }
 0x201   : > { %v764_v30 = vrot.slane %v2945_v9, 1  ;;  %v853_v48 = vrot.slane %v2945_v9, 2 }
 0x202   : > { %v2932_v63 = vpop.permute.xlu1 %916  ;;  %v2934_v60 = vpop.permute.xlu0 %868 }
 0x203   : > { %v766_v36 = vsel %vm728_vm4, %v764_v30, %v765_v53  ;;  %v855_v58 = vsel %vm817_vm3, %v853_v48, %v854_v7  ;;  %v1258_v12 = vsel %vm1253_vm6, %v1241_v34, %v2932_v63 }
 0x204   : > { %1190 = vrot.lane.b32.xlu1 %v852_v62, %s2307_s23  ;;  %1035 = vrot.lane.b32.xlu0 %v850_v21, %s3364_s22 }
 0x206   : > { %v1124_v2 = vpop.permute.xlu1 %1123  ;;  %v1072_v3 = vpop.permute.xlu0 %1071 }
 0x207   : > { %v1324_v19 = vsel %vm1321_vm10, %v1307_v16, %v1124_v2  ;;  %v1308_v31 = vsel %vm1304_vm9, %v1291_v51, %v1072_v3  ;;  %v699_v51 = vld [vmem:[#allocation2 + $0xc8] sm:$0xff] }
 0x208   : > { %882 = vrot.lane.b32.xlu1 %v850_v21, %s3365_s9  ;;  %795 = vrot.lane.b32.xlu0 %v763_v35, %s3363_s13  ;;  %v958_v48 = vrot.slane %v699_v51, 1 }
 0x20a   : > { %v2949_v13 = vpop.permute.xlu1 %970  ;;  %v2951_v14 = vpop.permute.xlu0 %918 }
 0x20c   : > { %1085 = vrot.lane.b32.xlu1 %v2945_v9, %s2305_s17  ;;  %1037 = vrot.lane.b32.xlu0 %v852_v62, %s3364_s22 }
 0x20e   : > { %v1177_v61 = vpop.permute.xlu1 %1176  ;;  %v1126_v22 = vpop.permute.xlu0 %1125 }
 0x20f   : > { %v1341_v33 = vsel %vm1338_vm11, %v1324_v19, %v1177_v61  ;;  %v1325_v2 = vsel %vm1321_vm10, %v1308_v31, %v1126_v22  ;;  %v857_v19 = vsel %vm817_vm3, %v854_v7, %v856_v1  ;;  %v1275_v31 = vsel %vm1270_vm7, %v1258_v12, %v2949_v13  ;;  %v700_v1 = vld [vmem:[#allocation2 + $0xd0] sm:$0x3] }
 0x210   : > { %932 = vrot.lane.b32.xlu1 %v2945_v9, %s2302_s16  ;;  %884 = vrot.lane.b32.xlu0 %v852_v62, %s3365_s9  ;;  %v767_v62 = vrot.slane %v697_v23, 1  ;;  %v1225_v13 = vsel %vm341_vm1, %v2710_v45, %v2925_v47 }
 0x211   : > { %2060 = vmatprep.mubr.msk.f32.mxu1 %vm1367_vm12, %v1341_v33 }
 0x212   : > { %v2978_v21 = vpop.permute.xlu1 %972  ;;  %v2980_v35 = vpop.permute.xlu0 %781  ;;  %v768_v3 = vsel %vm728_vm4, %v765_v53, %v767_v62 }
 0x214   : > { %1139 = vrot.lane.b32.xlu1 %v766_v36, %s2306_s18  ;;  %1087 = vrot.lane.b32.xlu0 %v2953_v18, %s2305_s17 }
 0x216   : > { %v1179_v27 = vpop.permute.xlu1 %1178  ;;  %v1024_v4 = vpop.permute.xlu0 %1023 }
 0x217   : > { %v1342_v55 = vsel %vm1338_vm11, %v1325_v2, %v1179_v27  ;;  %v1292_v41 = vsel %vm1287_vm8, %v1275_v31, %v1024_v4  ;;  %v1242_v27 = vsel %vm1236_vm5, %v1225_v13, %v2934_v60  ;;  %v1013_v31 = vrot.slane %v700_v1, 2 }
 0x218   : > { %986 = vrot.lane.b32.xlu1 %v766_v36, %s3362_s21  ;;  %934 = vrot.lane.b32.xlu0 %v2953_v18, %s2302_s16 }
 0x219   : > { %2061 = vmatmul.mubr.msk.f32.gmra.mrb[2].mxu1 %vm1367_vm12, %v1342_v55  ;;  %v1259_v55 = vsel %vm1253_vm6, %v1242_v27, %v2951_v14 }
 0x21a   : > { %v2999_v8 = vpop.permute.xlu1 %870  ;;  %v3001_v24 = vpop.permute.xlu0 %783  ;;  %v1276_v45 = vsel %vm1270_vm7, %v1259_v55, %v2978_v21 }
 0x21c   : > { %1192 = vrot.lane.b32.xlu1 %v855_v58, %s2307_s23  ;;  %1141 = vrot.lane.b32.xlu0 %v768_v3, %s2306_s18 }
 0x21e   : > { %v1074_v16 = vpop.permute.xlu1 %1073  ;;  %v1026_v30 = vpop.permute.xlu0 %1025 }
 0x21f   : > { %v1309_v11 = vsel %vm1304_vm9, %v1292_v41, %v1074_v16  ;;  %v1293_v47 = vsel %vm1287_vm8, %v1276_v45, %v1026_v30 }
 0x220   : > { %988 = vrot.lane.b32.xlu1 %v768_v3, %s3362_s21  ;;  %797 = vrot.lane.b32.xlu0 %v766_v36, %s3363_s13  ;;  %v698_v36 = vld [vmem:[#allocation2 + $0xc0] sm:$0xff] }
 0x221   : > { %v957_v40 = vrot.slane %v698_v36, 1  ;;  %v1010_v16 = vrot.slane %v698_v36, 2 }
 0x222   : > { %v3008_v61 = vpop.permute.xlu1 %920  ;;  %v3010_v53 = vpop.permute.xlu0 %872 }
 0x223   : > { %v959_v4 = vsel %vm728_vm4, %v957_v40, %v958_v48 }
 0x224   : > { %1194 = vrot.lane.b32.xlu1 %v857_v19, %s2307_s23  ;;  %1039 = vrot.lane.b32.xlu0 %v855_v58, %s3364_s22 }
 0x226   : > { %v1128_v22 = vpop.permute.xlu1 %1127  ;;  %v1076_v33 = vpop.permute.xlu0 %1075 }
 0x227   : > { %v1326_v63 = vsel %vm1321_vm10, %v1309_v11, %v1128_v22  ;;  %v1310_v60 = vsel %vm1304_vm9, %v1293_v47, %v1076_v33  ;;  %v960_v22 = vrot.slane %v700_v1, 1  ;;  %v1226_v1 = vsel %vm341_vm1, %v2757_v6, %v2980_v35 }
 0x228   : > { %886 = vrot.lane.b32.xlu1 %v855_v58, %s3365_s9  ;;  %799 = vrot.lane.b32.xlu0 %v768_v3, %s3363_s13  ;;  %s2008_s13 = sshll.u32 %s2279_s27, 4 }
 0x229   : > { %v961_v30 = vsel %vm728_vm4, %v958_v48, %v960_v22 }
 0x22a   : > { %v3023_v23 = vpop.permute.xlu1 %974  ;;  %v3025_v17 = vpop.permute.xlu0 %922 }
 0x22c   : > { %1089 = vrot.lane.b32.xlu1 %v698_v36, %s2305_s17  ;;  %1041 = vrot.lane.b32.xlu0 %v857_v19, %s3364_s22 }
 0x22e   : > { %v1181_v7 = vpop.permute.xlu1 %1180  ;;  %v1130_v62 = vpop.permute.xlu0 %1129 }
 0x22f   : > { %v1343_v2 = vsel %vm1338_vm11, %v1326_v63, %v1181_v7  ;;  %v1327_v14 = vsel %vm1321_vm10, %v1310_v60, %v1130_v62  ;;  %v702_v63 = vld [vmem:[#allocation2 + $0xe0] sm:$0xff]  ;;  %v701_v7 = vld [vmem:[#allocation2 + $0xd8] sm:$0xff]  ;;  %v703_v62 = vld [vmem:[#allocation2 + $0xe8] sm:$0x3]  ;;  %v1243_v60 = vsel %vm1236_vm5, %v1226_v1, %v2999_v8 }
 0x230   : > { %936 = vrot.lane.b32.xlu1 %v698_v36, %s2302_s16  ;;  %888 = vrot.lane.b32.xlu0 %v857_v19, %s3365_s9  ;;  %v1011_v19 = vrot.slane %v699_v51, 2  ;;  %v1114_v13 = vrot.slane %v701_v7, 1  ;;  %v1117_v27 = vrot.slane %v703_v62, 1  ;;  %v1168_v45 = vrot.slane %v702_v63, 2 }
 0x231   : > { %2063 = vmatprep.mubr.msk.f32.mxu1 %vm1367_vm12, %v1343_v2  ;;  %v1115_v2 = vrot.slane %v702_v63, 1  ;;  %v1167_v47 = vrot.slane %v701_v7, 2  ;;  %v1170_v22 = vrot.slane %v703_v62, 2 }
 0x232   : > { %v3046_v58 = vpop.permute.xlu1 %976  ;;  %v3048_v3 = vpop.permute.xlu0 %785  ;;  %v1012_v21 = vsel %vm817_vm3, %v1010_v16, %v1011_v19 }
 0x233   : > { %v1118_v16 = vsel %vm728_vm4, %v1115_v2, %v1117_v27 }
 0x234   : > { %1143 = vrot.lane.b32.xlu1 %v959_v4, %s2306_s18  ;;  %1091 = vrot.lane.b32.xlu0 %v699_v51, %s2305_s17 }
 0x236   : > { %v1183_v42 = vpop.permute.xlu1 %1182  ;;  %v1028_v34 = vpop.permute.xlu0 %1027 }
 0x237   : > { %v1344_v12 = vsel %vm1338_vm11, %v1327_v14, %v1183_v42  ;;  %v1260_v14 = vsel %vm1253_vm6, %v1243_v60, %v3008_v61 }
 0x238   : > { %990 = vrot.lane.b32.xlu1 %v959_v4, %s3362_s21  ;;  %938 = vrot.lane.b32.xlu0 %v699_v51, %s2302_s16  ;;  %v1014_v51 = vsel %vm817_vm3, %v1011_v19, %v1013_v31  ;;  %v1116_v19 = vsel %vm728_vm4, %v1114_v13, %v1115_v2  ;;  %v1277_v6 = vsel %vm1270_vm7, %v1260_v14, %v3023_v23 }
 0x239   : > { %2064 = vmatmul.mubr.msk.f32.gmra.mrb[4].mxu1 %vm1367_vm12, %v1344_v12  ;;  %v1294_v35 = vsel %vm1287_vm8, %v1277_v6, %v1028_v34  ;;  %v1227_v23 = vsel %vm341_vm1, %v2759_v29, %v3001_v24  ;;  %v1580_v34 = vld [vmem:[%s3348_s5] sm:$0xf] }
 0x23a   : > { %v3063_v33 = vpop.permute.xlu1 %874  ;;  %v3065_v36 = vpop.permute.xlu0 %787  ;;  %2081 = vmatprep.subr.msk.mxu1 %vm402_vm0, %v1580_v34 }
 0x23b   : > { %2082 = vmatpush3.msk.msra.mxu1 %vm402_vm0, %v1580_v34 }
 0x23c   : > { %1196 = vrot.lane.b32.xlu1 %v1012_v21, %s2307_s23  ;;  %1145 = vrot.lane.b32.xlu0 %v961_v30, %s2306_s18 }
 0x23e   : > { %v1078_v41 = vpop.permute.xlu1 %1077  ;;  %v1030_v11 = vpop.permute.xlu0 %1029 }
 0x23f   : > { %v1311_v8 = vsel %vm1304_vm9, %v1294_v35, %v1078_v41  ;;  %v1244_v41 = vsel %vm1236_vm5, %v1227_v23, %v3010_v53 }
 0x240   : > { %1043 = vrot.lane.b32.xlu1 %v1012_v21, %s3364_s22  ;;  %992 = vrot.lane.b32.xlu0 %v961_v30, %s3362_s21  ;;  %v1171_v21 = vsel %vm817_vm3, %v1168_v45, %v1170_v22  ;;  %v1169_v30 = vsel %vm817_vm3, %v1167_v47, %v1168_v45 }
 0x242   : > { %v3072_v40 = vpop.permute.xlu1 %924  ;;  %v3074_v48 = vpop.permute.xlu0 %876 }
 0x244   : > { %1045 = vrot.lane.b32.xlu1 %v1014_v51, %s3364_s22  ;;  %1198 = vrot.lane.b32.xlu0 %v1014_v51, %s2307_s23  ;;  %s2004_s22 = sshll.u32 %s2283_s28, 5  ;;  %s3366_s28 = sand.u32 1, %s2271_s25  }
 0x245   : > { %s1846_s16 = sadd.s32 %s2008_s13, %s2004_s22  ;;  %s2308_s22 = smov [#allocation3]  }
 0x246   : > { %v1132_v4 = vpop.permute.xlu1 %1131  ;;  %v1080_v55 = vpop.permute.xlu0 %1079 }
 0x247   : > { %v1328_v31 = vsel %vm1321_vm10, %v1311_v8, %v1132_v4 }
 0x248   : > { %1095 = vrot.lane.b32.xlu1 %v702_v63, %s2305_s17  ;;  %1093 = vrot.lane.b32.xlu0 %v701_v7, %s2305_s17  ;;  %v1261_v7 = vsel %vm1253_vm6, %v1244_v41, %v3025_v17  ;;  %s2005_s17 = sshll.u32 %s1846_s16, 7  ;;  %s2205_s16 = sshll.u32 %s2308_s22, 4  ;;  %s2206_s16 = int_to_ptr.vmem [resolvable:$false] %s2205_s16 }
 0x249   : > { %v1278_v24 = vsel %vm1270_vm7, %v1261_v7, %v3046_v58  ;;  %s3281_s27 = scalar_lea.hbm %s3350_s7, %s2005_s17  ;;  %s2207_s17 = scalar_lea.vmem %s2206_s16, 4096 }
 0x24a   : > { %v979_v42 = vpop.permute.xlu1 %978  ;;  %v927_v12 = vpop.permute.xlu0 %926  ;;  %v1295_v2 = vsel %vm1287_vm8, %v1278_v24, %v1030_v11  ;;  %v1228_v11 = vsel %vm341_vm1, %v2789_v26, %v3048_v3  ;;  %v1229_v3 = vsel %vm341_vm1, %v2791_v28, %v3065_v36 }
 0x24b   : > { %v1312_v13 = vsel %vm1304_vm9, %v1295_v2, %v1080_v55  ;;  %v1245_v55 = vsel %vm1236_vm5, %v1228_v11, %v3063_v33  ;;  %v1246_v33 = vsel %vm1236_vm5, %v1229_v3, %v3074_v48 }
 0x24c   : > { %1149 = vrot.lane.b32.xlu1 %v1118_v16, %s2306_s18  ;;  %1147 = vrot.lane.b32.xlu0 %v1116_v19, %s2306_s18  ;;  %v1262_v14 = vsel %vm1253_vm6, %v1245_v55, %v3072_v40  ;;  %v1263_v40 = vsel %vm1253_vm6, %v1246_v33, %v927_v12  ;;  %s1849_s18 = sshll.u32 %s2660_s20, 4  ;;  %s3284_s18 = int_to_ptr.vmem [resolvable:$true] %s1849_s18 }
 0x24d   : > { %v1279_v8 = vsel %vm1270_vm7, %v1262_v14, %v979_v42  ;;  %s2201_s13 = scalar_lea.vmem %s3284_s18, 2048  ;;  %p2208_p6 = scmp.lt.s32.totalorder %s3284_s18, %s2206_s16 }
 0x24e   : > { %v1185_v61 = vpop.permute.xlu1 %1184  ;;  %v1134_v51 = vpop.permute.xlu0 %1133  ;;  %p2202_p2 = scmp.ne.s32.totalorder %s3284_s18, %s2201_s13  ;;  %p2209_p7 = scmp.lt.s32.totalorder %s2207_s17, %s2201_s13 }
 0x24f   : > { %v1345_v63 = vsel %vm1338_vm11, %v1328_v31, %v1185_v61  ;;  %v1329_v53 = vsel %vm1321_vm10, %v1312_v13, %v1134_v51 }
 0x250   : > { %1202 = vrot.lane.b32.xlu1 %v1171_v21, %s2307_s23  ;;  %1200 = vrot.lane.b32.xlu0 %v1169_v30, %s2307_s23  ;;  %s3290_s23 = scalar_lea.sflag [#allocation4], %s3366_s28  ;;  %p2203_p4 = pnand %p2202_p2, %p2401_p3 }
 0x251   : > { %2066 = vmatprep.mubr.msk.f32.mxu1 %vm1367_vm12, %v1345_v63  ;;  %p2210_p9 = por %p2209_p7, %p2208_p6 }
 0x252   : > { %v981_v62 = vpop.permute.xlu1 %980  ;;  %v790_v29 = vpop.permute.xlu0 %789  ;;  %p2204_p5 = pneg %p2203_p4 }
 0x253   : > { %v1280_v23 = vsel %vm1270_vm7, %v1263_v40, %v981_v62 }
 0x254   : > { %p2211_p10 = pnand %p2210_p9, %p2204_p5 }
 0x256   : > { %v1187_v27 = vpop.permute.xlu1 %1186  ;;  %v1032_v4 = vpop.permute.xlu0 %1031 }
 0x257   : > { %v1346_v1 = vsel %vm1338_vm11, %v1329_v53, %v1187_v27  ;;  %v1296_v21 = vsel %vm1287_vm8, %v1279_v8, %v1032_v4 }
 0x258   : > { %2067 = vmatmul.mubr.msk.f32.gmra.mrb[6].mxu1 %vm1367_vm12, %v1346_v1  ;;  %v1230_v1 = vsel %vm341_vm1, %v2821_v52, %v790_v29 }
 0x25a   : > { %v879_v17 = vpop.permute.xlu1 %878  ;;  %v792_v45 = vpop.permute.xlu0 %791 }
 0x25b   : > { %v1231_v52 = vsel %vm341_vm1, %v2827_v57, %v792_v45 }
 0x25e   : > { %v1082_v47 = vpop.permute.xlu1 %1081  ;;  %v1034_v60 = vpop.permute.xlu0 %1033 }
 0x25f   : > { %v1313_v30 = vsel %vm1304_vm9, %v1296_v21, %v1082_v47  ;;  %v1297_v34 = vsel %vm1287_vm8, %v1280_v23, %v1034_v60  ;;  %v1247_v47 = vsel %vm1236_vm5, %v1230_v1, %v879_v17 }
 0x262   : > { %v929_v16 = vpop.permute.xlu1 %928  ;;  %v881_v19 = vpop.permute.xlu0 %880 }
 0x263   : > { %v1264_v60 = vsel %vm1253_vm6, %v1247_v47, %v929_v16  ;;  %v1248_v29 = vsel %vm1236_vm5, %v1231_v52, %v881_v19 }
 0x266   : > { %v1136_v22 = vpop.permute.xlu1 %1135  ;;  %v1084_v58 = vpop.permute.xlu0 %1083 }
 0x267   : > { %v1330_v31 = vsel %vm1321_vm10, %v1313_v30, %v1136_v22  ;;  %v1314_v41 = vsel %vm1304_vm9, %v1297_v34, %v1084_v58 }
 0x26a   : > { %v983_v6 = vpop.permute.xlu1 %982  ;;  %v931_v35 = vpop.permute.xlu0 %930 }
 0x26b   : > { %v1281_v11 = vsel %vm1270_vm7, %v1264_v60, %v983_v6  ;;  %v1265_v17 = vsel %vm1253_vm6, %v1248_v29, %v931_v35 }
 0x26e   : > { %v1189_v61 = vpop.permute.xlu1 %1188  ;;  %v1138_v51 = vpop.permute.xlu0 %1137 }
 0x26f   : > { %v1347_v26 = vsel %vm1338_vm11, %v1330_v31, %v1189_v61  ;;  %v1331_v7 = vsel %vm1321_vm10, %v1314_v41, %v1138_v51 }
 0x270   : > { %2069 = vmatprep.mubr.msk.f32.mxu1 %vm1367_vm12, %v1347_v26 }
 0x272   : > { %v985_v42 = vpop.permute.xlu1 %984  ;;  %v794_v63 = vpop.permute.xlu0 %793 }
 0x273   : > { %v1282_v61 = vsel %vm1270_vm7, %v1265_v17, %v985_v42 }
 0x276   : > { %v1191_v24 = vpop.permute.xlu1 %1190  ;;  %v1036_v2 = vpop.permute.xlu0 %1035 }
 0x277   : > { %v1348_v28 = vsel %vm1338_vm11, %v1331_v7, %v1191_v24  ;;  %v1298_v55 = vsel %vm1287_vm8, %v1281_v11, %v1036_v2  ;;  %v1232_v24 = vsel %vm341_vm1, %v2872_v38, %v794_v63 }
 0x278   : > { %2070 = vmatmul.mubr.msk.f32.gmra.mrb[8].mxu1 %vm1367_vm12, %v1348_v28 }
 0x27a   : > { %v883_v36 = vpop.permute.xlu1 %882  ;;  %v796_v48 = vpop.permute.xlu0 %795 }
 0x27b   : > { %v1249_v2 = vsel %vm1236_vm5, %v1232_v24, %v883_v36  ;;  %v1233_v38 = vsel %vm341_vm1, %v2879_v46, %v796_v48 }
 0x27e   : > { %v1086_v13 = vpop.permute.xlu1 %1085  ;;  %v1038_v12 = vpop.permute.xlu0 %1037 }
 0x27f   : > { %v1315_v14 = vsel %vm1304_vm9, %v1298_v55, %v1086_v13  ;;  %v1299_v51 = vsel %vm1287_vm8, %v1282_v61, %v1038_v12 }
 0x282   : > { %v933_v53 = vpop.permute.xlu1 %932  ;;  %v885_v27 = vpop.permute.xlu0 %884 }
 0x283   : > { %v1266_v28 = vsel %vm1253_vm6, %v1249_v2, %v933_v53  ;;  %v1250_v63 = vsel %vm1236_vm5, %v1233_v38, %v885_v27 }
 0x286   : > { %v1140_v4 = vpop.permute.xlu1 %1139  ;;  %v1088_v62 = vpop.permute.xlu0 %1087 }
 0x287   : > { %v1332_v8 = vsel %vm1321_vm10, %v1315_v14, %v1140_v4  ;;  %v1316_v26 = vsel %vm1304_vm9, %v1299_v51, %v1088_v62 }
 0x28a   : > { %v987_v22 = vpop.permute.xlu1 %986  ;;  %v935_v58 = vpop.permute.xlu0 %934 }
 0x28b   : > { %v1283_v4 = vsel %vm1270_vm7, %v1266_v28, %v987_v22  ;;  %v1267_v36 = vsel %vm1253_vm6, %v1250_v63, %v935_v58 }
 0x28e   : > { %v1193_v21 = vpop.permute.xlu1 %1192  ;;  %v1142_v30 = vpop.permute.xlu0 %1141 }
 0x28f   : > { %v1349_v31 = vsel %vm1338_vm11, %v1332_v8, %v1193_v21  ;;  %v1333_v3 = vsel %vm1321_vm10, %v1316_v26, %v1142_v30 }
 0x290   : > { %2072 = vmatprep.mubr.msk.f32.mxu1 %vm1367_vm12, %v1349_v31 }
 0x292   : > { %v989_v16 = vpop.permute.xlu1 %988  ;;  %v798_v6 = vpop.permute.xlu0 %797 }
 0x293   : > { %v1284_v14 = vsel %vm1270_vm7, %v1267_v36, %v989_v16  ;;  %v1234_v58 = vsel %vm341_vm1, %v2945_v9, %v798_v6 }
 0x296   : > { %v1195_v33 = vpop.permute.xlu1 %1194  ;;  %v1040_v40 = vpop.permute.xlu0 %1039 }
 0x297   : > { %v1350_v57 = vsel %vm1338_vm11, %v1333_v3, %v1195_v33  ;;  %v1300_v62 = vsel %vm1287_vm8, %v1283_v4, %v1040_v40 }
 0x298   : > { %2073 = vmatmul.mubr.msk.f32.gmra.mrb[10].mxu1 %vm1367_vm12, %v1350_v57 }
 0x29a   : > { %v887_v45 = vpop.permute.xlu1 %886  ;;  %v800_v19 = vpop.permute.xlu0 %799 }
 0x29b   : > { %v1235_v29 = vsel %vm341_vm1, %v2953_v18, %v800_v19  ;;  %v1251_v17 = vsel %vm1236_vm5, %v1234_v58, %v887_v45 }
 0x29e   : > { %v1090_v23 = vpop.permute.xlu1 %1089  ;;  %v1042_v35 = vpop.permute.xlu0 %1041 }
 0x29f   : > { %v1317_v1 = vsel %vm1304_vm9, %v1300_v62, %v1090_v23  ;;  %v1301_v8 = vsel %vm1287_vm8, %v1284_v14, %v1042_v35 }
 0x2a2   : > { %v937_v34 = vpop.permute.xlu1 %936  ;;  %v889_v41 = vpop.permute.xlu0 %888 }
 0x2a3   : > { %v1252_v16 = vsel %vm1236_vm5, %v1235_v29, %v889_v41  ;;  %v1268_v61 = vsel %vm1253_vm6, %v1251_v17, %v937_v34 }
 0x2a6   : > { %v1144_v7 = vpop.permute.xlu1 %1143  ;;  %v1092_v42 = vpop.permute.xlu0 %1091 }
 0x2a7   : > { %v1334_v47 = vsel %vm1321_vm10, %v1317_v1, %v1144_v7  ;;  %v1318_v21 = vsel %vm1304_vm9, %v1301_v8, %v1092_v42  ;;  %v1965_v7 = vld [vmem:[%s3347_s4] ss:$0 sm:$0xff] }
 0x2aa   : > { %v991_v13 = vpop.permute.xlu1 %990  ;;  %v939_v12 = vpop.permute.xlu0 %938 }
 0x2ab   : > { %v1269_v51 = vsel %vm1253_vm6, %v1252_v16, %v939_v12  ;;  %v1285_v33 = vsel %vm1270_vm7, %v1268_v61, %v991_v13 }
 0x2ae   : > { %v1197_v60 = vpop.permute.xlu1 %1196  ;;  %v1146_v11 = vpop.permute.xlu0 %1145 }
 0x2af   : > { %v1351_v55 = vsel %vm1338_vm11, %v1334_v47, %v1197_v60  ;;  %v1335_v30 = vsel %vm1321_vm10, %v1318_v21, %v1146_v11 }
 0x2b0   : > { %2075 = vmatprep.mubr.msk.f32.mxu1 %vm1367_vm12, %v1351_v55 }
 0x2b2   : > { %v1044_v53 = vpop.permute.xlu1 %1043  ;;  %v993_v22 = vpop.permute.xlu0 %992 }
 0x2b3   : > { %v1286_v40 = vsel %vm1270_vm7, %v1269_v51, %v993_v22  ;;  %v1302_v57 = vsel %vm1287_vm8, %v1285_v33, %v1044_v53 }
 0x2b6   : > { %v1046_v31 = vpop.permute.xlu1 %1045  ;;  %v1199_v52 = vpop.permute.xlu0 %1198 }
 0x2b7   : > { %v1352_v46 = vsel %vm1338_vm11, %v1335_v30, %v1199_v52  ;;  %v1303_v9 = vsel %vm1287_vm8, %v1286_v40, %v1046_v31 }
 0x2b8   : > { %2076 = vmatmul.mubr.msk.f32.gmra.mrb[12].mxu1 %vm1367_vm12, %v1352_v46 }
 0x2ba   : > { %v1096_v48 = vpop.permute.xlu1 %1095  ;;  %v1094_v27 = vpop.permute.xlu0 %1093 }
 0x2bb   : > { %v1320_v18 = vsel %vm1304_vm9, %v1303_v9, %v1096_v48  ;;  %v1319_v6 = vsel %vm1304_vm9, %v1302_v57, %v1094_v27 }
 0x2be   : > { %v1150_v26 = vpop.permute.xlu1 %1149  ;;  %v1148_v3 = vpop.permute.xlu0 %1147 }
 0x2bf   : > { %v1337_v45 = vsel %vm1321_vm10, %v1320_v18, %v1150_v26  ;;  %v1336_v19 = vsel %vm1321_vm10, %v1319_v6, %v1148_v3 }
 0x2c2   : > { %v1203_v23 = vpop.permute.xlu1 %1202  ;;  %v1201_v35 = vpop.permute.xlu0 %1200 }
 0x2c3   : > { %v1354_v34 = vsel %vm1338_vm11, %v1337_v45, %v1203_v23  ;;  %v1353_v41 = vsel %vm1338_vm11, %v1336_v19, %v1201_v35 }
 0x2c4   : > { %2078 = vmatprep.mubr.msk.f32.mxu1 %vm1367_vm12, %v1353_v41 }
 0x2c5   : > { %2079 = vmatmul.mubr.msk.f32.gmra.mrb[14].mxu1 %vm1367_vm12, %v1354_v34 }
 0x2cc   : > { %v2059_v42 = vpop.f32.mrb[0].mxu1 }
 0x2cd   : > { %v1491_v24 = vadd.f32 %v2059_v42, %v1965_v7  ;;  %v1485_v2 = vpop.f32.mrb[1].mxu1 }
 0x2ce   : > { %v1486_v28 = vadd.f32 %v1965_v7, %v1485_v2 }
 0x2cf   : > { %v1565_v12 = vmax.f32 %v1491_v24, 0.0  ;;  %v3228_v24 = vld [vmem:[%s3349_s6] ss:$0 sm:$0xff] }
 0x2d0   : > { %v1564_v13 = vmax.f32 %v1486_v28, 0.0 }
 0x2d2   : > { %2083 = vmatprep.mubr.msk.f32.mxu1 %vm341_vm1, %v1564_v13 }
 0x2d3   : > { %2084 = vmatmul.mubr.msk.f32.vlgmr.msra.gmra.mrb[16].mxu1 %vm341_vm1, %v1565_v12 }
 0x2ec   : > { %v2062_v4 = vpop.f32.mrb[2].mxu1 }
 0x2ed   : > { %v1501_v62 = vadd.f32 %v2062_v4, %v1965_v7  ;;  %v1495_v1 = vpop.f32.mrb[3].mxu1 }
 0x2ee   : > { %v1496_v47 = vadd.f32 %v1965_v7, %v1495_v1 }
 0x2ef   : > { %v1567_v11 = vmax.f32 %v1501_v62, 0.0 }
 0x2f0   : > { %v1566_v60 = vmax.f32 %v1496_v47, 0.0 }
 0x2f2   : > { %2086 = vmatprep.mubr.msk.f32.mxu1 %vm341_vm1, %v1566_v60 }
 0x2f3   : > { %2087 = vmatmul.mubr.msk.f32.gmra.mrb[18].mxu1 %vm341_vm1, %v1567_v11 }
 0x30c   : > { %v2065_v55 = vpop.f32.mrb[4].mxu1 }
 0x30d   : > { %v1511_v38 = vadd.f32 %v2065_v55, %v1965_v7  ;;  %v1505_v63 = vpop.f32.mrb[5].mxu1 }
 0x30e   : > { %v1506_v36 = vadd.f32 %v1965_v7, %v1505_v63 }
 0x30f   : > { %v1569_v22 = vmax.f32 %v1511_v38, 0.0 }
 0x310   : > { %v1568_v53 = vmax.f32 %v1506_v36, 0.0 }
 0x312   : > { %2089 = vmatprep.mubr.msk.f32.mxu1 %vm341_vm1, %v1568_v53 }
 0x313   : > { %2090 = vmatmul.mubr.msk.f32.gmra.mrb[20].mxu1 %vm341_vm1, %v1569_v22 }
 0x32b   : > { %v2068_v14 = vpop.f32.mrb[6].mxu1 }
 0x32c   : > { %v1521_v8 = vadd.f32 %v2068_v14, %v1965_v7  ;;  %v1515_v21 = vpop.f32.mrb[7].mxu1 }
 0x32d   : > { %v1516_v30 = vadd.f32 %v1965_v7, %v1515_v21 }
 0x32e   : > { %v1571_v52 = vmax.f32 %v1521_v8, 0.0 }
 0x32f   : > { %v1570_v31 = vmax.f32 %v1516_v30, 0.0 }
 0x331   : > { %2092 = vmatprep.mubr.msk.f32.mxu1 %vm341_vm1, %v1570_v31 }
 0x332   : > { %2093 = vmatmul.mubr.msk.f32.gmra.mrb[22].mxu1 %vm341_vm1, %v1571_v52 }
 0x34b   : > { %v2071_v46 = vpop.f32.mrb[8].mxu1 }
 0x34c   : > { %v1531_v48 = vadd.f32 %v2071_v46, %v1965_v7  ;;  %v1525_v27 = vpop.f32.mrb[9].mxu1 }
 0x34d   : > { %v1526_v58 = vadd.f32 %v1965_v7, %v1525_v27 }
 0x34e   : > { %v1573_v17 = vmax.f32 %v1531_v48, 0.0 }
 0x34f   : > { %v1572_v29 = vmax.f32 %v1526_v58, 0.0 }
 0x351   : > { %2095 = vmatprep.mubr.msk.f32.mxu1 %vm341_vm1, %v1572_v29 }
 0x352   : > { %2096 = vmatmul.mubr.msk.f32.gmra.mrb[24].mxu1 %vm341_vm1, %v1573_v17 }
 0x36b   : > { %v2074_v16 = vpop.f32.mrb[10].mxu1 }
 0x36c   : > { %v1541_v61 = vadd.f32 %v2074_v16, %v1965_v7  ;;  %v1535_v51 = vpop.f32.mrb[11].mxu1 }
 0x36d   : > { %v1536_v26 = vadd.f32 %v1965_v7, %v1535_v51 }
 0x36e   : > { %v1575_v33 = vmax.f32 %v1541_v61, 0.0 }
 0x36f   : > { %v1574_v3 = vmax.f32 %v1536_v26, 0.0 }
 0x371   : > { %2098 = vmatprep.mubr.msk.f32.mxu1 %vm341_vm1, %v1574_v3 }
 0x372   : > { %2099 = vmatmul.mubr.msk.f32.gmra.mrb[26].mxu1 %vm341_vm1, %v1575_v33 }
 0x38b   : > { %v2077_v40 = vpop.f32.mrb[12].mxu1 }
 0x38c   : > { %v1551_v57 = vadd.f32 %v2077_v40, %v1965_v7  ;;  %v1545_v9 = vpop.f32.mrb[13].mxu1 }
 0x38d   : > { %v1546_v18 = vadd.f32 %v1965_v7, %v1545_v9 }
 0x38e   : > { %v1577_v45 = vmax.f32 %v1551_v57, 0.0 }
 0x38f   : > { %v1576_v6 = vmax.f32 %v1546_v18, 0.0 }
 0x391   : > { %2101 = vmatprep.mubr.msk.f32.mxu1 %vm341_vm1, %v1576_v6 }
 0x392   : > { %2102 = vmatmul.mubr.msk.f32.gmra.mrb[28].mxu1 %vm341_vm1, %v1577_v45 }
 0x398   : > { %v2080_v19 = vpop.f32.mrb[14].mxu1 }
 0x399   : > { %v1561_v23 = vadd.f32 %v2080_v19, %v1965_v7  ;;  %v1555_v35 = vpop.f32.mrb[15].mxu1 }
 0x39a   : > { %v1556_v34 = vadd.f32 %v1965_v7, %v1555_v35 }
 0x39b   : > { %v1579_v42 = vmax.f32 %v1561_v23, 0.0 }
 0x39c   : > { %v1578_v41 = vmax.f32 %v1556_v34, 0.0 }
 0x39e   : > { %2104 = vmatprep.mubr.msk.f32.mxu1 %vm341_vm1, %v1578_v41 }
 0x39f   : > { %2105 = vmatmul.mubr.msk.f32.gmra.mrb[30].mxu1 %vm341_vm1, %v1579_v42 }
 0x3a6   : > { %v2085_v2 = vpop.f32.mrb[16].mxu1 }
 0x3a7   : > { %v1711_v28 = vadd.f32 %v2085_v2, %v3228_v24  ;;  %v1705_v13 = vpop.f32.mrb[17].mxu1 }
 0x3a8   : > { %v1706_v12 = vadd.f32 %v3228_v24, %v1705_v13 }
 0x3a9   : > { %v1785_v7 = vmax.f32 %v1711_v28, 0.0 }
 0x3aa   : > { %v1784_v4 = vmax.f32 %v1706_v12, 0.0 }
 0x3ab   : > { %v1801_v62 = vadd.f32 %v1785_v7, %v2580_v44 }
 0x3ac   : > { %v1800_v1 = vadd.f32 %v1784_v4, %v2575_v39 }
 0x3ad   : > { %1817 = vst [vmem:[%s2660_s20 + $0x8] sm:$0xff] %v1801_v62 }
 0x3ae   : > { %1816 = vst [vmem:[%s2660_s20] sm:$0xff] %v1800_v1 }
 0x3c6   : > { %v2088_v47 = vpop.f32.mrb[18].mxu1 }
 0x3c7   : > { %v1721_v60 = vadd.f32 %v2088_v47, %v3228_v24  ;;  %v1715_v11 = vpop.f32.mrb[19].mxu1 }
 0x3c8   : > { %v1716_v55 = vadd.f32 %v3228_v24, %v1715_v11 }
 0x3c9   : > { %v1787_v38 = vmax.f32 %v1721_v60, 0.0 }
 0x3ca   : > { %v1786_v63 = vmax.f32 %v1716_v55, 0.0 }
 0x3cb   : > { %v1803_v36 = vadd.f32 %v1787_v38, %v2590_v54 }
 0x3cc   : > { %v1802_v53 = vadd.f32 %v1786_v63, %v2585_v49 }
 0x3cd   : > { %1819 = vst [vmem:[%s2660_s20 + $0x18] sm:$0xff] %v1803_v36 }
 0x3ce   : > { %1818 = vst [vmem:[%s2660_s20 + $0x10] sm:$0xff] %v1802_v53 }
 0x3e6   : > { %v2091_v44 = vpop.f32.mrb[20].mxu1 }
 0x3e7   : > { %v1731_v39 = vadd.f32 %v2091_v44, %v3228_v24  ;;  %v1725_v22 = vpop.f32.mrb[21].mxu1 }
 0x3e8   : > { %v1726_v14 = vadd.f32 %v3228_v24, %v1725_v22 }
 0x3e9   : > { %v1789_v8 = vmax.f32 %v1731_v39, 0.0 }
 0x3ea   : > { %v1788_v21 = vmax.f32 %v1726_v14, 0.0 }
 0x3eb   : > { %v1805_v30 = vadd.f32 %v1789_v8, %v2600_v0 }
 0x3ec   : > { %v1804_v31 = vadd.f32 %v1788_v21, %v2595_v59 }
 0x3ed   : > { %1821 = vst [vmem:[%s2660_s20 + $0x28] sm:$0xff] %v1805_v30 }
 0x3ee   : > { %1820 = vst [vmem:[%s2660_s20 + $0x20] sm:$0xff] %v1804_v31 }
 0x405   : > { %v2094_v54 = vpop.f32.mrb[22].mxu1 }
 0x406   : > { %v1741_v49 = vadd.f32 %v2094_v54, %v3228_v24  ;;  %v1735_v52 = vpop.f32.mrb[23].mxu1 }
 0x407   : > { %v1736_v46 = vadd.f32 %v3228_v24, %v1735_v52 }
 0x408   : > { %v1791_v48 = vmax.f32 %v1741_v49, 0.0 }
 0x409   : > { %v1790_v27 = vmax.f32 %v1736_v46, 0.0 }
 0x40a   : > { %v1807_v58 = vadd.f32 %v1791_v48, %v2610_v10 }
 0x40b   : > { %v1806_v29 = vadd.f32 %v1790_v27, %v2605_v5 }
 0x40c   : > { %1823 = vst [vmem:[%s2660_s20 + $0x38] sm:$0xff] %v1807_v58 }
 0x40d   : > { %1822 = vst [vmem:[%s2660_s20 + $0x30] sm:$0xff] %v1806_v29 }
 0x425   : > { %v2097_v0 = vpop.f32.mrb[24].mxu1 }
 0x426   : > { %v1751_v59 = vadd.f32 %v2097_v0, %v3228_v24  ;;  %v1745_v17 = vpop.f32.mrb[25].mxu1 }
 0x427   : > { %v1746_v16 = vadd.f32 %v3228_v24, %v1745_v17 }
 0x428   : > { %v1793_v61 = vmax.f32 %v1751_v59, 0.0 }
 0x429   : > { %v1792_v51 = vmax.f32 %v1746_v16, 0.0 }
 0x42a   : > { %v1809_v26 = vadd.f32 %v1793_v61, %v2620_v20 }
 0x42b   : > { %v1808_v3 = vadd.f32 %v1792_v51, %v2615_v15 }
 0x42c   : > { %1825 = vst [vmem:[%s2660_s20 + $0x48] sm:$0xff] %v1809_v26 }
 0x42d   : > { %1824 = vst [vmem:[%s2660_s20 + $0x40] sm:$0xff] %v1808_v3 }
 0x445   : > { %v2100_v10 = vpop.f32.mrb[26].mxu1 }
 0x446   : > { %v1761_v5 = vadd.f32 %v2100_v10, %v3228_v24  ;;  %v1755_v33 = vpop.f32.mrb[27].mxu1 }
 0x447   : > { %v1756_v40 = vadd.f32 %v3228_v24, %v1755_v33 }
 0x448   : > { %v1795_v57 = vmax.f32 %v1761_v5, 0.0 }
 0x449   : > { %v1794_v9 = vmax.f32 %v1756_v40, 0.0 }
 0x44a   : > { %v1811_v18 = vadd.f32 %v1795_v57, %v2630_v32 }
 0x44b   : > { %v1810_v20 = vadd.f32 %v1794_v9, %v2625_v25 }
 0x44c   : > { %1827 = vst [vmem:[%s2660_s20 + $0x58] sm:$0xff] %v1811_v18 }
 0x44d   : > { %1826 = vst [vmem:[%s2660_s20 + $0x50] sm:$0xff] %v1810_v20 }
 0x465   : > { %v2103_v15 = vpop.f32.mrb[28].mxu1 }
 0x466   : > { %v1771_v6 = vadd.f32 %v2103_v15, %v3228_v24  ;;  %v1765_v45 = vpop.f32.mrb[29].mxu1 }
 0x467   : > { %v1766_v19 = vadd.f32 %v3228_v24, %v1765_v45 }
 0x468   : > { %v1797_v23 = vmax.f32 %v1771_v6, 0.0 }
 0x469   : > { %v1796_v35 = vmax.f32 %v1766_v19, 0.0 }
 0x46a   : > { %v1813_v34 = vadd.f32 %v1797_v23, %v2640_v43 }
 0x46b   : > { %v1812_v41 = vadd.f32 %v1796_v35, %v2635_v37 }
 0x46c   : > { %1829 = vst [vmem:[%s2660_s20 + $0x68] sm:$0xff] %v1813_v34 }
 0x46d   : > { %1828 = vst [vmem:[%s2660_s20 + $0x60] sm:$0xff] %v1812_v41 }
 0x472   : > { %v2106_v25 = vpop.f32.mrb[30].mxu1 }
 0x473   : > { %v1781_v32 = vadd.f32 %v2106_v25, %v3228_v24  ;;  %v1775_v42 = vpop.f32.mrb[31].mxu1 }
 0x474   : > { %v1776_v2 = vadd.f32 %v3228_v24, %v1775_v42 }
 0x475   : > { %v1799_v28 = vmax.f32 %v1781_v32, 0.0 }
 0x476   : > { %v1798_v43 = vmax.f32 %v1776_v2, 0.0 }
 0x477   : > { %v1815_v37 = vadd.f32 %v1799_v28, %v2650_v56 }
 0x478   : > { %v1814_v13 = vadd.f32 %v1798_v43, %v2645_v50 }
 0x479   : > { %1831 = vst [vmem:[%s2660_s20 + $0x78] sm:$0xff] %v1815_v37 }
 0x47a   : > { %1830 = vst [vmem:[%s2660_s20 + $0x70] sm:$0xff] %v1814_v13 }
 0x47b   : > { %2214 = shalt.err (!%p2211_p10)
}
 0x47c   : > { %s2215_s20 = scalar_lea.hbm %s3281_s27, 2048  ;;  %s2219_s28 = scalar_lea.hbm %s3350_s7, 8192 }
 0x47d   : > { %p2216_p11 = scmp.ne.s32.totalorder %s3281_s27, %s2215_s20  ;;  %p2220_p0 = scmp.lt.u32.totalorder %s3281_s27, %s3350_s7 }
 0x47e   : > { %p2221_p1 = scmp.lt.u32.totalorder %s2219_s28, %s2215_s20  ;;  %p2223_p4 = scmp.lt.u32.totalorder %s2215_s20, %s3281_s27 }
 0x47f   : > { %p2217_p12 = pnand %p2216_p11, %p2401_p3 }
 0x480   : > { %p2222_p2 = por %p2221_p1, %p2220_p0 }
 0x481   : > { %p2218_p13 = pneg %p2217_p12 }
 0x482   : > { %p2224_p5 = por %p2223_p4, %p2222_p2 }
 0x484   : > { %p2225_p6 = pnand %p2224_p5, %p2218_p13 }
 0x486   : > { %2228 = shalt.err (!%p2225_p6)
}
 0x487   : > { %s2309_s13 = smov 128  }
 0x488   : > { %2117 = dma.vmem_to_hbm [thread:$0]  (%p2401_p3), %s3284_s18, 2048, %s3281_s27, %s3290_s23, %s2309_s13, %s2309_s13, %s3365_s9  }
 0x489 PF: > { %p2123_p7 = scmp.ge.s32.totalorder %s2295_s8, 2  ;;  %s1864_s17 = sand.u32 1, %s2267_s24  }
 0x48a   : > { %s1865_s20 = scalar_lea.sflag [#allocation4], %s1864_s17 }
 0x48b   : > { %p2120_p9 = pnand %p2123_p7, %p2410_p8 }
 0x48d   : > { %2262 = dma.done.wait (!%p2120_p9), %s1865_s20, 2048  }
 0x48e   : > { %2264 = vsyncadd (!%p2120_p9), %s1865_s20, 4294965248  ;;  %s20_s8 = sadd.s32 1, %s2295_s8   ;;  %s3367_s24 = smov %s2271_s25 }
 0x48f   : > { %p17_p10 = scmp.ge.s32.totalorder %s20_s8, 6   ;;  %s3368_s25 = smov %s2275_s26 }
 0x490   : > { %s3369_s26 = smov %s2419_s19  ;;  %s3370_s27 = smov %s2287_s29 }
 0x491   : > { %s3371_s28 = smov %s2291_s30  ;;  %s3372_s29 = smov %s3375_s11 }
 0x492   : > { %s3373_s30 = smov %s3379_s12  ;;  %19 = sbr.rel (!%p17_p10) target bundleno = 5 (0x5), region = 92 }
 0x499   :  { %1870 = vsyncpa [#allocation4], 1 }
 0x49a   :  { %1872 = vsyncpa [#allocation4 + $0x1], 1 }

</bundles_post_ra>
